<compile_context>
chip_gen: v7x
topology: tpu7x:2x2x1
jax: 0.10.0
libtpu: 0.0.40
codegen_flags: <defaults>
</compile_context>

<pallas_src>
import functools
import math

import jax
import jax.numpy as jnp
from jax import lax
from jax.experimental import pallas as pl
from jax.experimental.pallas import tpu as pltpu

SCALE = 1.0
MB = 1024 * 1024
NR_TILE = 2048        # Nr tile inside the square-distance kernel
NR_CHUNK = 2048       # ref-point chunk for the running kNN top-k merge


def _tpu_config():
    """Generation-dependent tiling / VMEM limits (v5e/v6e: 128 MiB, v7x: 64 MiB)."""
    vmem = None
    try:
        info = pltpu.get_tpu_info()
        vmem = getattr(info, "vmem_capacity_bytes", None)
    except Exception:
        vmem = None
    if vmem is None:
        vmem = 64 * MB                      # conservative default (v7x-like)
    if vmem >= 100 * MB:                    # v5e / v6e
        return {"vmem_limit": 96 * MB, "row_tile": 1024, "row_tile_bigk": 512,
                "grouped_budget": 16 * MB}
    return {"vmem_limit": 40 * MB, "row_tile": 512, "row_tile_bigk": 256,
            "grouped_budget": 8 * MB}


CFG = _tpu_config()


def _round_up(x, m):
    return ((x + m - 1) // m) * m


def _pick_row_tile(m, kmax):
    cap = CFG["row_tile_bigk"] if kmax >= 2048 else CFG["row_tile"]
    if m >= cap:
        return cap
    return max(8, _round_up(m, 8))


def _pick_grouped_tile(m, bytes_per_row):
    cap = (CFG["grouped_budget"] // max(int(bytes_per_row), 1)) // 8 * 8
    cap = max(8, min(CFG["row_tile"], cap))
    if m >= cap:
        return cap
    return max(8, _round_up(m, 8))


def _apply_act(y, act):
    if act == "leaky":
        return jnp.where(y > 0, y, 0.1 * y)
    if act == "relu":
        return jnp.maximum(y, 0.0)
    if act == "sigmoid":
        return jax.nn.sigmoid(y)
    if act == "tanh":
        return jnp.tanh(y)
    return y  # "none"


# ---------------------------------------------------------------------------
# Fused per-row MLP stack (1x1 conv chains)
# ---------------------------------------------------------------------------
def _mlp_stack_kernel(*refs, acts, pre_act):
    n_layers = len(acts)
    x_ref = refs[0]
    o_ref = refs[-1]
    y = x_ref[...]
    if pre_act != "none":
        y = _apply_act(y.astype(jnp.float32), pre_act).astype(jnp.bfloat16)
    for i in range(n_layers):
        w = refs[1 + 2 * i][...]
        b = refs[2 + 2 * i][...]
        y = jnp.dot(y, w, preferred_element_type=jnp.float32) + b
        y = _apply_act(y, acts[i])
        if i + 1 < n_layers:
            y = y.astype(jnp.bfloat16)
    o_ref[...] = y.astype(o_ref.dtype)


@functools.lru_cache(maxsize=None)
def _mlp_stack_callable(mp, tm, dims, acts, pre_act, out_dt):
    n_layers = len(acts)
    in_specs = [pl.BlockSpec((tm, dims[0]), lambda i: (i, 0))]
    for li in range(n_layers):
        k, n = dims[li], dims[li + 1]
        # TODO(synk): resident weights keep default double-buffering; pl.Buffered(1)
        # would free a little VMEM but is left off for lowering safety.
        in_specs.append(pl.BlockSpec((k, n), lambda i: (0, 0)))
        in_specs.append(pl.BlockSpec((1, n), lambda i: (0, 0)))
    f = pl.pallas_call(
        functools.partial(_mlp_stack_kernel, acts=acts, pre_act=pre_act),
        out_shape=jax.ShapeDtypeStruct((mp, dims[-1]), jnp.dtype(out_dt)),
        grid=(mp // tm,),
        in_specs=in_specs,
        out_specs=pl.BlockSpec((tm, dims[-1]), lambda i: (i, 0)),
        compiler_params=pltpu.CompilerParams(
            dimension_semantics=("parallel",),
            vmem_limit_bytes=CFG["vmem_limit"]),
    )
    return jax.jit(f)


def mlp_stack(x, layers, acts, pre_act="none", out_dtype=jnp.bfloat16):
    acts = tuple(acts)
    shp = x.shape
    k0 = int(shp[-1])
    x2d = x.reshape(-1, k0)
    m = x2d.shape[0]
    dims = (k0,) + tuple(int(p["w"].shape[1]) for p in layers)
    tm = _pick_row_tile(m, max(dims))
    mp = _round_up(m, tm)
    xp = x2d if mp == m else jnp.pad(x2d, ((0, mp - m), (0, 0)))
    args = [xp.astype(jnp.bfloat16)]
    for p in layers:
        args.append(p["w"].astype(jnp.bfloat16))
        args.append(p["b"].reshape(1, -1).astype(jnp.float32))
    out = _mlp_stack_callable(mp, tm, dims, acts, pre_act,
                              jnp.dtype(out_dtype).name)(*args)
    return out[:m].reshape(shp[:-1] + (dims[-1],))


def conv_pt(p, x, act="leaky", out_dtype=jnp.bfloat16):
    return mlp_stack(x, [p], (act,), out_dtype=out_dtype)


def conv_pt_pair(p, a, b, act="leaky", out_dtype=jnp.bfloat16):
    """Run one 1x1 conv on two equally-shaped tensors in a single call."""
    y = conv_pt(p, jnp.concatenate([a, b], 0), act, out_dtype=out_dtype)
    n = a.shape[0]
    return y[:n], y[n:]


# ---------------------------------------------------------------------------
# Squared distances (Nr-tiled) + chunked kNN
# ---------------------------------------------------------------------------
def _sqdist_kernel(a_ref, b_ref, bb_ref, o_ref):
    a = a_ref[0]                               # (tm, 3) f32
    b = b_ref[0]                               # (tn, 3) f32
    ab = lax.dot_general(a, b, (((1,), (1,)), ((), ())),
                         preferred_element_type=jnp.float32)
    aa = jnp.sum(a * a, axis=-1, keepdims=True)
    o_ref[0] = aa + bb_ref[0] - 2.0 * ab


@functools.lru_cache(maxsize=None)
def _sqdist_callable(bsz, nqp, nrp, tm, tn):
    f = pl.pallas_call(
        _sqdist_kernel,
        out_shape=jax.ShapeDtypeStruct((bsz, nqp, nrp), jnp.float32),
        grid=(bsz, nqp // tm, nrp // tn),
        in_specs=[
            pl.BlockSpec((1, tm, 3), lambda b, i, j: (b, i, 0)),
            pl.BlockSpec((1, tn, 3), lambda b, i, j: (b, j, 0)),
            pl.BlockSpec((1, 1, tn), lambda b, i, j: (b, 0, j)),
        ],
        out_specs=pl.BlockSpec((1, tm, tn), lambda b, i, j: (b, i, j)),
        compiler_params=pltpu.CompilerParams(
            dimension_semantics=("parallel", "parallel", "parallel"),
            vmem_limit_bytes=CFG["vmem_limit"]),
    )
    return jax.jit(f)


def square_distance(src, dst):
    """src [B,Nq,3], dst [B,Nr,3] -> [B,Nq,Nr] squared distances (f32)."""
    bsz, nq, _ = src.shape
    nr = dst.shape[1]
    src = src.astype(jnp.float32)
    dst = dst.astype(jnp.float32)
    tm = _pick_row_tile(nq, 3)
    nqp = _round_up(nq, tm)
    tn = NR_TILE if nr > NR_TILE else max(8, _round_up(nr, 8))
    nrp = _round_up(nr, tn)
    srcp = src if nqp == nq else jnp.pad(src, ((0, 0), (0, nqp - nq), (0, 0)))
    dstp = dst if nrp == nr else jnp.pad(dst, ((0, 0), (0, nrp - nr), (0, 0)))
    bb = jnp.sum(dstp * dstp, axis=-1)[:, None, :]
    d = _sqdist_callable(bsz, nqp, nrp, tm, tn)(srcp, dstp, bb)
    return d[:, :nq, :nr]


def knn(query, ref, k):
    # TODO(synk): exact running top-k fused inside the distance kernel deferred;
    # the ref points are processed in NR_CHUNK slabs with a running merge so the
    # full [B,Nq,Nr] matrix is never resident.
    nr = ref.shape[1]
    if nr <= NR_CHUNK:
        d = square_distance(query, ref)
        neg, idx = lax.top_k(-d, k)
        return -neg, idx
    best_d = None
    best_i = None
    for s in range(0, nr, NR_CHUNK):
        e = min(s + NR_CHUNK, nr)
        d = square_distance(query, lax.slice_in_dim(ref, s, e, axis=1))
        kk = min(k, e - s)
        neg, idx = lax.top_k(-d, kk)
        cd, ci = -neg, idx + s
        if best_d is None:
            best_d, best_i = cd, ci
        else:
            ad = jnp.concatenate([best_d, cd], -1)
            ai = jnp.concatenate([best_i, ci], -1)
            neg, pos = lax.top_k(-ad, k)
            best_d = -neg
            best_i = jnp.take_along_axis(ai, pos, axis=-1)
    return best_d, best_i


def index_points_group(points, idx):
    """points [B,M,C], idx [B,...] -> [B,...,C]"""
    return jax.vmap(lambda p, i: p[i])(points, idx)


# ---------------------------------------------------------------------------
# Generic fused grouped-MLP kernel (multi-segment layer 0, broadcast center,
# optional max-over-K).  Replaces concat([g_feat, center, g_xyz]) @ MLP chains.
# ---------------------------------------------------------------------------
def _grouped_stack_kernel(*refs, kinds, acts, reduce_after):
    n_seg = len(kinds)
    n_layers = len(acts)
    seg_refs = refs[:n_seg]
    w0_refs = refs[n_seg:2 * n_seg]
    b0_ref = refs[2 * n_seg]
    layer_refs = refs[2 * n_seg + 1:-1]
    o_ref = refs[-1]

    acc = None        # grouped contributions, (tm*K, n0)
    pacc = None       # per-point contributions, (tm, n0)
    tm = kk = None
    for r, w_ref, kind in zip(seg_refs, w0_refs, kinds):
        x = r[...]
        ww = w_ref[...]
        if kind == "g":
            tm, kk, ci = x.shape
            contrib = jnp.dot(x.reshape(tm * kk, ci), ww,
                              preferred_element_type=jnp.float32)
            acc = contrib if acc is None else acc + contrib
        else:
            contrib = jnp.dot(x, ww, preferred_element_type=jnp.float32)
            pacc = contrib if pacc is None else pacc + contrib

    y = acc + b0_ref[...]
    n0 = y.shape[-1]
    y = y.reshape(tm, kk, n0)
    if pacc is not None:
        y = y + pacc[:, None, :]               # broadcast center over K
    y = _apply_act(y, acts[0])
    if reduce_after == 0:
        y = jnp.max(y, axis=1)
    else:
        y = y.reshape(tm * kk, n0)
    for li in range(1, n_layers):
        ww = layer_refs[2 * (li - 1)][...]
        bb = layer_refs[2 * (li - 1) + 1][...]
        y = jnp.dot(y.astype(jnp.bfloat16), ww,
                    preferred_element_type=jnp.float32) + bb
        y = _apply_act(y, acts[li])
        if reduce_after == li:
            y = jnp.max(y.reshape(tm, kk, y.shape[-1]), axis=1)
    if reduce_after is None:
        o_ref[...] = y.reshape(tm, kk, y.shape[-1]).astype(o_ref.dtype)
    else:
        o_ref[...] = y.astype(o_ref.dtype)


@functools.lru_cache(maxsize=None)
def _grouped_stack_callable(rp, tm, kk, kinds, widths, seg_dts, dims, acts,
                            reduce_after, out_dt):
    n_layers = len(acts)
    in_specs = []
    for kind, w in zip(kinds, widths):
        if kind == "g":
            in_specs.append(pl.BlockSpec((tm, kk, w), lambda i: (i, 0, 0)))
        else:
            in_specs.append(pl.BlockSpec((tm, w), lambda i: (i, 0)))
    n0 = dims[0]
    for w in widths:
        in_specs.append(pl.BlockSpec((w, n0), lambda i: (0, 0)))
    in_specs.append(pl.BlockSpec((1, n0), lambda i: (0, 0)))
    for li in range(1, n_layers):
        in_specs.append(pl.BlockSpec((dims[li - 1], dims[li]), lambda i: (0, 0)))
        in_specs.append(pl.BlockSpec((1, dims[li]), lambda i: (0, 0)))
    if reduce_after is None:
        out_shape = jax.ShapeDtypeStruct((rp, kk, dims[-1]), jnp.dtype(out_dt))
        out_spec = pl.BlockSpec((tm, kk, dims[-1]), lambda i: (i, 0, 0))
    else:
        out_shape = jax.ShapeDtypeStruct((rp, dims[-1]), jnp.dtype(out_dt))
        out_spec = pl.BlockSpec((tm, dims[-1]), lambda i: (i, 0))
    f = pl.pallas_call(
        functools.partial(_grouped_stack_kernel, kinds=kinds, acts=acts,
                          reduce_after=reduce_after),
        out_shape=out_shape,
        grid=(rp // tm,),
        in_specs=in_specs,
        out_specs=out_spec,
        compiler_params=pltpu.CompilerParams(
            dimension_semantics=("parallel",),
            vmem_limit_bytes=CFG["vmem_limit"]),
    )
    return jax.jit(f)


def grouped_stack(segments, layers, acts, reduce_after, out_dtype=jnp.bfloat16):
    """segments: list of (array, kind) in the reference concat order.
    kind='g' -> grouped [B,N,K,C]; kind='p' -> per-point [B,N,C] broadcast over K.
    Layer-0 weight rows follow the segment concat order."""
    acts = tuple(acts)
    kinds = tuple(k for _, k in segments)
    arrs = [a for a, _ in segments]
    g0 = arrs[kinds.index("g")]
    bsz, npts, kk, _ = g0.shape
    rows = bsz * npts
    widths = tuple(int(a.shape[-1]) for a in arrs)
    dims = tuple(int(p["w"].shape[1]) for p in layers)
    gw = sum(w for w, kd in zip(widths, kinds) if kd == "g")
    bytes_per_row = kk * (gw * 4 + max(dims) * 8) + 4 * sum(widths)
    tm = _pick_grouped_tile(rows, bytes_per_row)
    rp = _round_up(rows, tm)

    ins = []
    for a, kd in zip(arrs, kinds):
        if kd == "g":
            a2 = a.reshape(rows, kk, a.shape[-1])
            if rp != rows:
                a2 = jnp.pad(a2, ((0, rp - rows), (0, 0), (0, 0)))
        else:
            a2 = a.reshape(rows, a.shape[-1])
            if rp != rows:
                a2 = jnp.pad(a2, ((0, rp - rows), (0, 0)))
        ins.append(a2)
    w0 = layers[0]["w"]
    off = 0
    for a, wd in zip(arrs, widths):
        sl = lax.slice_in_dim(w0, off, off + wd, axis=0)
        sl = sl.astype(jnp.bfloat16 if a.dtype == jnp.bfloat16 else jnp.float32)
        ins.append(sl)
        off += wd
    ins.append(layers[0]["b"].reshape(1, -1).astype(jnp.float32))
    for p in layers[1:]:
        ins.append(p["w"].astype(jnp.bfloat16))
        ins.append(p["b"].reshape(1, -1).astype(jnp.float32))

    seg_dts = tuple(str(a.dtype) for a in arrs)
    out = _grouped_stack_callable(rp, tm, kk, kinds, widths, seg_dts, dims, acts,
                                  reduce_after, jnp.dtype(out_dtype).name)(*ins)
    if reduce_after is None:
        return out[:rows].reshape(bsz, npts, kk, dims[-1])
    return out[:rows].reshape(bsz, npts, dims[-1])


# ---------------------------------------------------------------------------
# Fully fused PointConv kernel (weightnet + grouped aggregation + linear)
# ---------------------------------------------------------------------------
def _pointconv_kernel(gxyz_ref, gfeat_ref, w0_ref, b0_ref, w1_ref, b1_ref,
                      w2_ref, b2_ref, wlf_ref, wlx_ref, bl_ref, o_ref, *, wn):
    gxyz = gxyz_ref[...]                       # (tm, K, 3) f32 (xyz stays f32)
    gfeat = gfeat_ref[...]                     # (tm, K, C) bf16
    tm, kk, _ = gxyz.shape
    cc = gfeat.shape[-1]
    # WeightNet (3 -> wn -> wn -> wn), ReLU, f32 throughout.
    h = gxyz.reshape(tm * kk, 3)
    h = jnp.maximum(jnp.dot(h, w0_ref[...], preferred_element_type=jnp.float32) + b0_ref[...], 0.0)
    h = jnp.maximum(jnp.dot(h, w1_ref[...], preferred_element_type=jnp.float32) + b1_ref[...], 0.0)
    h = jnp.maximum(jnp.dot(h, w2_ref[...], preferred_element_type=jnp.float32) + b2_ref[...], 0.0)
    wt = h.reshape(tm, kk, wn)
    wlf = wlf_ref[...]                         # (wn*C, out) bf16, rows in (w, c) order
    wlx = wlx_ref[...]                         # (wn*3, out) f32
    y = None
    for w in range(wn):                        # static unroll, wn == 8
        s = wt[:, :, w:w + 1]                  # (tm, K, 1) f32
        af = jnp.sum(gfeat * s, axis=1).astype(jnp.bfloat16)   # (tm, C)
        ax = jnp.sum(gxyz * s, axis=1)                          # (tm, 3) f32
        part = jnp.dot(af, wlf[w * cc:(w + 1) * cc, :],
                       preferred_element_type=jnp.float32)
        part = part + jnp.dot(ax, wlx[w * 3:(w + 1) * 3, :],
                              preferred_element_type=jnp.float32)
        y = part if y is None else y + part
    y = y + bl_ref[...]
    y = jnp.where(y > 0, y, 0.1 * y)           # leaky
    o_ref[...] = y.astype(o_ref.dtype)


@functools.lru_cache(maxsize=None)
def _pointconv_callable(rp, tm, kk, cc, wn, out_ch):
    in_specs = [
        pl.BlockSpec((tm, kk, 3), lambda i: (i, 0, 0)),
        pl.BlockSpec((tm, kk, cc), lambda i: (i, 0, 0)),
        pl.BlockSpec((3, wn), lambda i: (0, 0)),
        pl.BlockSpec((1, wn), lambda i: (0, 0)),
        pl.BlockSpec((wn, wn), lambda i: (0, 0)),
        pl.BlockSpec((1, wn), lambda i: (0, 0)),
        pl.BlockSpec((wn, wn), lambda i: (0, 0)),
        pl.BlockSpec((1, wn), lambda i: (0, 0)),
        pl.BlockSpec((wn * cc, out_ch), lambda i: (0, 0)),
        pl.BlockSpec((wn * 3, out_ch), lambda i: (0, 0)),
        pl.BlockSpec((1, out_ch), lambda i: (0, 0)),
    ]
    f = pl.pallas_call(
        functools.partial(_pointconv_kernel, wn=wn),
        out_shape=jax.ShapeDtypeStruct((rp, out_ch), jnp.bfloat16),
        grid=(rp // tm,),
        in_specs=in_specs,
        out_specs=pl.BlockSpec((tm, out_ch), lambda i: (i, 0)),
        compiler_params=pltpu.CompilerParams(
            dimension_semantics=("parallel",),
            vmem_limit_bytes=CFG["vmem_limit"]),
    )
    return jax.jit(f)


def _pointconv_apply(p, center_xyz, src_xyz, src_feat, nsample):
    bsz, npts, _ = center_xyz.shape
    _, idx = knn(center_xyz, src_xyz, nsample)
    g_xyz = (index_points_group(src_xyz, idx) - center_xyz[:, :, None, :]).astype(jnp.float32)
    g_feat = index_points_group(src_feat, idx).astype(jnp.bfloat16)
    kk = nsample
    cc = int(g_feat.shape[-1])
    wn = int(p["wn"][0]["w"].shape[1])
    out_ch = int(p["linear"]["w"].shape[1])
    # Permute linear rows from the reference (c, w) flatten order to the kernel's
    # (w, c) accumulation order; split xyz rows so g_xyz stays f32.
    w3 = p["linear"]["w"].reshape(cc + 3, wn, out_ch)
    wlf = jnp.transpose(w3[:cc], (1, 0, 2)).reshape(wn * cc, out_ch).astype(jnp.bfloat16)
    wlx = jnp.transpose(w3[cc:], (1, 0, 2)).reshape(wn * 3, out_ch).astype(jnp.float32)
    rows = bsz * npts
    bytes_per_row = kk * (cc + 3) * 16 + wn * (cc + 3) * 8
    tm = _pick_grouped_tile(rows, bytes_per_row)
    rp = _round_up(rows, tm)

    def padrows(a):
        return a if rp == rows else jnp.pad(a, ((0, rp - rows), (0, 0), (0, 0)))

    args = [
        padrows(g_xyz.reshape(rows, kk, 3)),
        padrows(g_feat.reshape(rows, kk, cc)),
        p["wn"][0]["w"].astype(jnp.float32), p["wn"][0]["b"].reshape(1, -1).astype(jnp.float32),
        p["wn"][1]["w"].astype(jnp.float32), p["wn"][1]["b"].reshape(1, -1).astype(jnp.float32),
        p["wn"][2]["w"].astype(jnp.float32), p["wn"][2]["b"].reshape(1, -1).astype(jnp.float32),
        wlf, wlx, p["linear"]["b"].reshape(1, -1).astype(jnp.float32),
    ]
    out = _pointconv_callable(rp, tm, kk, cc, wn, out_ch)(*args)
    return out[:rows].reshape(bsz, npts, out_ch)


# ---------------------------------------------------------------------------
# Fully fused GRUMappingNoGCN kernel (mlp = [c, c], c == latent dim)
# ---------------------------------------------------------------------------
def _gru_kernel(gp2_ref, dxyz_ref, p1_ref, w0g_ref, w0x_ref, b0_ref, wf_ref,
                wfro_ref, wr1_ref, br1_ref, wz1_ref, bz1_ref, wh1_ref, bh1_ref,
                o_ref, *, c0):
    gp2 = gp2_ref[...]                          # (tm, K, D2) bf16
    dxyz = dxyz_ref[...]                        # (tm, K, 3) f32
    p1 = p1_ref[...]                            # (tm, D1) f32
    tm, kk, d2 = gp2.shape

    def lk(v):
        return jnp.where(v > 0, v, 0.1 * v)

    rzh0 = (jnp.dot(gp2.reshape(tm * kk, d2), w0g_ref[...],
                    preferred_element_type=jnp.float32)
            + jnp.dot(dxyz.reshape(tm * kk, 3), w0x_ref[...],
                      preferred_element_type=jnp.float32)
            + b0_ref[...])                      # (tm*K, 3c0)
    g = jnp.dot(p1.astype(jnp.bfloat16), wf_ref[...],
                preferred_element_type=jnp.float32)    # (tm, 2c0)
    gr = g[:, :c0]
    gz = g[:, c0:]

    # r gate (no max over K)
    r0 = lk(rzh0[:, :c0].reshape(tm, kk, c0) + gr[:, None, :])
    r = jax.nn.sigmoid(jnp.dot(r0.reshape(tm * kk, c0).astype(jnp.bfloat16),
                               wr1_ref[...], preferred_element_type=jnp.float32)
                       + br1_ref[...])          # (tm*K, c)

    # z gate (max over K before the last conv)
    z0 = lk(rzh0[:, c0:2 * c0].reshape(tm, kk, c0) + gz[:, None, :])
    zmax = jnp.max(z0, axis=1)
    z = jax.nn.sigmoid(jnp.dot(zmax.astype(jnp.bfloat16), wz1_ref[...],
                               preferred_element_type=jnp.float32) + bz1_ref[...])

    # h candidate: fuse_r_o(r * points1) added after conv0, max over K, tanh
    c = r.shape[-1]
    rp1 = r.reshape(tm, kk, c) * p1[:, None, :]
    pe = jnp.dot(rp1.reshape(tm * kk, c).astype(jnp.bfloat16), wfro_ref[...],
                 preferred_element_type=jnp.float32)    # (tm*K, c0)
    h0 = lk(rzh0[:, 2 * c0:] + pe).reshape(tm, kk, c0)
    hmax = jnp.max(h0, axis=1)
    h = jnp.tanh(jnp.dot(hmax.astype(jnp.bfloat16), wh1_ref[...],
                         preferred_element_type=jnp.float32) + bh1_ref[...])

    o_ref[...] = ((1.0 - z) * p1 + z * h).astype(o_ref.dtype)


@functools.lru_cache(maxsize=None)
def _gru_callable(rp, tm, kk, d2, d1, c0, c):
    in_specs = [
        pl.BlockSpec((tm, kk, d2), lambda i: (i, 0, 0)),
        pl.BlockSpec((tm, kk, 3), lambda i: (i, 0, 0)),
        pl.BlockSpec((tm, d1), lambda i: (i, 0)),
        pl.BlockSpec((d2, 3 * c0), lambda i: (0, 0)),
        pl.BlockSpec((3, 3 * c0), lambda i: (0, 0)),
        pl.BlockSpec((1, 3 * c0), lambda i: (0, 0)),
        pl.BlockSpec((d1, 2 * c0), lambda i: (0, 0)),
        pl.BlockSpec((d1, c0), lambda i: (0, 0)),
        pl.BlockSpec((c0, c), lambda i: (0, 0)), pl.BlockSpec((1, c), lambda i: (0, 0)),
        pl.BlockSpec((c0, c), lambda i: (0, 0)), pl.BlockSpec((1, c), lambda i: (0, 0)),
        pl.BlockSpec((c0, c), lambda i: (0, 0)), pl.BlockSpec((1, c), lambda i: (0, 0)),
    ]
    f = pl.pallas_call(
        functools.partial(_gru_kernel, c0=c0),
        out_shape=jax.ShapeDtypeStruct((rp, c), jnp.float32),
        grid=(rp // tm,),
        in_specs=in_specs,
        out_specs=pl.BlockSpec((tm, c), lambda i: (i, 0)),
        compiler_params=pltpu.CompilerParams(
            dimension_semantics=("parallel",),
            vmem_limit_bytes=CFG["vmem_limit"]),
    )
    return jax.jit(f)


def gru_fwd(p, xyz1, xyz2, points1, points2, nsample):
    _, idx = knn(xyz1, xyz2, nsample)
    neighbor_xyz = index_points_group(xyz2, idx)
    dxyz = (neighbor_xyz - xyz1[:, :, None, :]).astype(jnp.float32)
    gp2 = index_points_group(points2, idx).astype(jnp.bfloat16)
    bsz, npts, kk, d2 = gp2.shape
    d1 = int(points1.shape[-1])
    c0 = int(p["r"][0]["w"].shape[1])
    c = int(p["r"][1]["w"].shape[1])
    assert len(p["r"]) == 2 and c == d1, "fused GRU assumes mlp=[c,c] with c == latent dim"

    w0 = jnp.concatenate([p["r"][0]["w"], p["z"][0]["w"], p["h"][0]["w"]], axis=1)
    b0 = jnp.concatenate([p["r"][0]["b"], p["z"][0]["b"], p["h"][0]["b"]], axis=0)
    wf = jnp.concatenate([p["fuse_r"]["w"], p["fuse_z"]["w"]], axis=1)

    rows = bsz * npts
    bytes_per_row = kk * (d2 * 4 + 3 * c0 * 8 + (c + c0) * 8) + 64
    tm = _pick_grouped_tile(rows, bytes_per_row)
    rp = _round_up(rows, tm)

    def padrows(a):
        if rp == rows:
            return a
        pad = ((0, rp - rows),) + ((0, 0),) * (a.ndim - 1)
        return jnp.pad(a, pad)

    args = [
        padrows(gp2.reshape(rows, kk, d2)),
        padrows(dxyz.reshape(rows, kk, 3)),
        padrows(points1.reshape(rows, d1).astype(jnp.float32)),
        w0[:d2].astype(jnp.bfloat16),
        w0[d2:].astype(jnp.float32),
        b0.reshape(1, -1).astype(jnp.float32),
        wf.astype(jnp.bfloat16),
        p["fuse_r_o"]["w"].astype(jnp.bfloat16),
        p["r"][1]["w"].astype(jnp.bfloat16), p["r"][1]["b"].reshape(1, -1).astype(jnp.float32),
        p["z"][1]["w"].astype(jnp.bfloat16), p["z"][1]["b"].reshape(1, -1).astype(jnp.float32),
        p["h"][1]["w"].astype(jnp.bfloat16), p["h"][1]["b"].reshape(1, -1).astype(jnp.float32),
    ]
    out = _gru_callable(rp, tm, kk, d2, d1, c0, c)(*args)
    return out[:rows].reshape(bsz, npts, c)


# ---------------------------------------------------------------------------
# Point-cloud utilities (JAX glue)
# ---------------------------------------------------------------------------
def farthest_point_sample(xyz, npoint):
    # TODO(synk): reference CUDA FPS starts from a random point; here start at index 0.
    bsz, n, _ = xyz.shape

    def body(i, state):
        dist, farthest, idxs = state
        idxs = idxs.at[:, i].set(farthest)
        centroid = xyz[jnp.arange(bsz), farthest][:, None, :]
        d = jnp.sum((xyz - centroid) ** 2, -1)
        dist = jnp.minimum(dist, d)
        farthest = jnp.argmax(dist, -1).astype(jnp.int32)
        return dist, farthest, idxs

    init = (jnp.full((bsz, n), 1e10, jnp.float32),
            jnp.zeros((bsz,), jnp.int32),
            jnp.zeros((bsz, npoint), jnp.int32))
    _, _, idxs = lax.fori_loop(0, npoint, body, init)
    return idxs


def _interp_weights(dist_sq):
    dist = jnp.maximum(jnp.sqrt(jnp.maximum(dist_sq, 0.0)), 1e-10)
    w = 1.0 / dist
    return w / jnp.sum(w, axis=-1, keepdims=True)


def upsample_flow(xyz, sparse_xyz, sparse_feat):
    d, idx = knn(xyz, sparse_xyz, 3)
    w = _interp_weights(d)
    grouped = index_points_group(sparse_feat, idx)
    return jnp.sum(w[..., None] * grouped, axis=2)


def point_warping(xyz1, xyz2, flow1):
    if flow1 is None:
        return xyz2
    xyz1_to_2 = xyz1 + flow1
    d, idx = knn(xyz2, xyz1_to_2, 3)
    w = _interp_weights(d)
    grouped_flow = index_points_group(flow1, idx)
    return xyz2 - jnp.sum(w[..., None] * grouped_flow, axis=2)


# ---------------------------------------------------------------------------
# Deterministic parameter initialization
# ---------------------------------------------------------------------------
class ParamGen:
    def __init__(self, key):
        self.key = key

    def conv(self, cin, cout, bias=True):
        self.key, kw, kb = jax.random.split(self.key, 3)
        bound = 1.0 / math.sqrt(cin)
        w = jax.random.uniform(kw, (cin, cout), jnp.float32, -bound, bound)
        if bias:
            b = jax.random.uniform(kb, (cout,), jnp.float32, -bound, bound)
        else:
            b = jnp.zeros((cout,), jnp.float32)
        return {"w": w, "b": b}


# ---------------------------------------------------------------------------
# PointConv / PointConvD / encoder
# ---------------------------------------------------------------------------
def init_pointconv(pg, in_ch, out_ch, wn=8):
    # TODO(synk): WeightNet batch-norm omitted (synthetic weights, no running stats).
    return {"wn": [pg.conv(3, wn), pg.conv(wn, wn), pg.conv(wn, wn)],
            "linear": pg.conv(in_ch * wn, out_ch)}


def pointconv_fwd(p, xyz, feat, nsample):
    return _pointconv_apply(p, xyz, xyz, feat, nsample)


def pointconvd_fwd(p, xyz, feat, npoint, nsample):
    fps_idx = farthest_point_sample(xyz, npoint)
    new_xyz = index_points_group(xyz, fps_idx)
    out = _pointconv_apply(p, new_xyz, xyz, feat, nsample)
    return new_xyz, out, fps_idx


def init_encoder(pg, wn=8):
    return {
        "level0_lift": pg.conv(3, 32),
        "level0": init_pointconv(pg, 32 + 3, 32, wn),
        "level0_1": pg.conv(32, 64),
        "level1": init_pointconv(pg, 64 + 3, 64, wn),
        "level1_0": pg.conv(64, 64),
        "level1_1": pg.conv(64, 128),
        "level2": init_pointconv(pg, 128 + 3, 128, wn),
        "level2_0": pg.conv(128, 128),
        "level2_1": pg.conv(128, 256),
        "level3": init_pointconv(pg, 256 + 3, 256, wn),
        "level3_0": pg.conv(256, 256),
        "level3_1": pg.conv(256, 512),
        "level4": init_pointconv(pg, 512 + 3, 256, wn),
    }


def encoder_fwd(p, xyz, color, npoints, feat_nei=32):
    feat_l0 = conv_pt(p["level0_lift"], color, "leaky")
    feat_l0 = pointconv_fwd(p["level0"], xyz, feat_l0, feat_nei)
    feat_l0_1 = conv_pt(p["level0_1"], feat_l0, "leaky")
    pc_l1, feat_l1, fps_l1 = pointconvd_fwd(p["level1"], xyz, feat_l0_1, npoints[0], feat_nei)
    feat_l1 = conv_pt(p["level1_0"], feat_l1, "leaky")
    feat_l1_2 = conv_pt(p["level1_1"], feat_l1, "leaky")
    pc_l2, feat_l2, fps_l2 = pointconvd_fwd(p["level2"], pc_l1, feat_l1_2, npoints[1], feat_nei)
    feat_l2 = conv_pt(p["level2_0"], feat_l2, "leaky")
    feat_l2_3 = conv_pt(p["level2_1"], feat_l2, "leaky")
    pc_l3, feat_l3, fps_l3 = pointconvd_fwd(p["level3"], pc_l2, feat_l2_3, npoints[2], feat_nei)
    feat_l3 = conv_pt(p["level3_0"], feat_l3, "leaky")
    feat_l3_4 = conv_pt(p["level3_1"], feat_l3, "leaky")
    pc_l4, feat_l4, fps_l4 = pointconvd_fwd(p["level4"], pc_l3, feat_l3_4, npoints[3], feat_nei)
    return ([xyz, pc_l1, pc_l2, pc_l3, pc_l4],
            [feat_l0, feat_l1, feat_l2, feat_l3, feat_l4],
            [fps_l1, fps_l2, fps_l3, fps_l4])


def encoder_pair(p, xyz1, xyz2, color1, color2, npoints, feat_nei):
    """Run the (shared-weight) encoder on both clouds in one stacked pass."""
    xyz = jnp.concatenate([xyz1, xyz2], 0)
    color = jnp.concatenate([color1, color2], 0)
    pcs, feats, idxs = encoder_fwd(p, xyz, color, npoints, feat_nei)
    bsz = xyz1.shape[0]
    split = lambda arrs: ([a[:bsz] for a in arrs], [a[bsz:] for a in arrs])
    pc1s, pc2s = split(pcs)
    f1s, f2s = split(feats)
    i1s, i2s = split(idxs)
    return pc1s, f1s, i1s, pc2s, f2s, i2s


# ---------------------------------------------------------------------------
# GRUMappingNoGCN / SceneFlowGRUResidual
# ---------------------------------------------------------------------------
def init_gru(pg, in_channel, latent_channel, mlp):
    last = in_channel + 3
    p = {"fuse_r": pg.conv(latent_channel, mlp[0], bias=False),
         "fuse_r_o": pg.conv(latent_channel, mlp[0], bias=False),
         "fuse_z": pg.conv(latent_channel, mlp[0], bias=False),
         "r": [], "z": [], "h": []}
    for out in mlp:
        p["r"].append(pg.conv(last, out))
        p["z"].append(pg.conv(last, out))
        p["h"].append(pg.conv(last, out))
        last = out
    return p


def init_sfgru(pg, feat_ch, cost_ch, channels):
    return {"gru": init_gru(pg, cost_ch, feat_ch, channels),
            "fc": pg.conv(channels[-1], 3)}


def sfgru_fwd(p, xyz, feats, cost_volume, flow=None, neighbors=9):
    feats_new = gru_fwd(p["gru"], xyz, xyz, feats, cost_volume, neighbors)
    new_points = feats_new - feats
    flow_local = jnp.clip(conv_pt(p["fc"], new_points, "none", out_dtype=jnp.float32),
                          -200.0, 200.0)
    flow = flow_local if flow is None else flow_local + flow
    return feats_new, flow


# ---------------------------------------------------------------------------
# Bidirectional / FlowEmbedding / Cross layers
# (source of these submodules not provided — approximated; see TODOs)
# ---------------------------------------------------------------------------
def init_bid(pg, in_channel, mlp):
    last = in_channel + 3
    convs = []
    for out in mlp:
        convs.append(pg.conv(last, out))
        last = out
    return {"convs": convs}


def bid_fwd(p, pc1, pc2, cfeat1, cfeat2, feat1, feat2, nsample, idx12=None, idx21=None):
    # TODO(synk): BidirectionalLayerFeatCosine source not provided; approximated with
    # kNN grouping + fused MLP + cosine-similarity softmax aggregation.
    if idx12 is None:
        _, idx12 = knn(pc1, pc2, nsample)
    if idx21 is None:
        _, idx21 = knn(pc2, pc1, nsample)
    # Merge both directions (shared weights, equal shapes) into one call.
    xyz_q = jnp.concatenate([pc1, pc2], 0)
    xyz_r = jnp.concatenate([pc2, pc1], 0)
    cfeat_r = jnp.concatenate([cfeat2, cfeat1], 0)
    feat_q = jnp.concatenate([feat1, feat2], 0)
    feat_r = jnp.concatenate([feat2, feat1], 0)
    idx = jnp.concatenate([idx12, idx21], 0)

    g_xyz = (index_points_group(xyz_r, idx) - xyz_q[:, :, None, :]).astype(jnp.float32)
    g_feat = index_points_group(cfeat_r, idx).astype(jnp.bfloat16)
    x = grouped_stack([(g_feat, "g"), (g_xyz, "g")],
                      p["convs"], ("leaky",) * len(p["convs"]), reduce_after=None)

    g_raw = index_points_group(feat_r, idx).astype(jnp.float32)
    fq = feat_q.astype(jnp.float32)
    qn = fq / (jnp.linalg.norm(fq, axis=-1, keepdims=True) + 1e-8)
    rn = g_raw / (jnp.linalg.norm(g_raw, axis=-1, keepdims=True) + 1e-8)
    cos = jnp.sum(qn[:, :, None, :] * rn, -1, keepdims=True)
    w = jax.nn.softmax(cos, axis=2)
    out = jnp.sum(w * x.astype(jnp.float32), axis=2).astype(jnp.bfloat16)
    bsz = pc1.shape[0]
    return out[:bsz], out[bsz:]


def init_fe(pg, in_channel, mlp):
    last = 2 * in_channel + 3
    convs = []
    for out in mlp:
        convs.append(pg.conv(last, out))
        last = out
    return {"convs": convs}


def fe_fwd(p, pc1, pc2, feat1_new, feat2_new, feat1, feat2, nsample, idx12=None):
    # TODO(synk): FlowEmbeddingLayer source not provided; kNN group + fused MLP
    # (center branch broadcast in-kernel) + max-pool.
    if idx12 is None:
        _, idx12 = knn(pc1, pc2, nsample)
    g_xyz = (index_points_group(pc2, idx12) - pc1[:, :, None, :]).astype(jnp.float32)
    g_feat2 = index_points_group(feat2_new, idx12).astype(jnp.bfloat16)
    nl = len(p["convs"])
    return grouped_stack([(g_feat2, "g"), (feat1_new.astype(jnp.bfloat16), "p"), (g_xyz, "g")],
                         p["convs"], ("leaky",) * nl, reduce_after=nl - 1)


def init_cross(pg, in_channel, mlp1, mlp2):
    c1, last = [], 2 * in_channel + 3
    for out in mlp1:
        c1.append(pg.conv(last, out))
        last = out
    c2, last = [], 2 * mlp1[-1] + 3
    for out in mlp2:
        c2.append(pg.conv(last, out))
        last = out
    return {"mlp1": c1, "mlp2": c2}


def _cross_agg(convs, xyz_q, xyz_r, feat_q, feat_r, nsample, idx=None):
    if idx is None:
        _, idx = knn(xyz_q, xyz_r, nsample)
    g_xyz = (index_points_group(xyz_r, idx) - xyz_q[:, :, None, :]).astype(jnp.float32)
    g_feat = index_points_group(feat_r, idx).astype(jnp.bfloat16)
    nl = len(convs)
    return grouped_stack([(g_feat, "g"), (feat_q.astype(jnp.bfloat16), "p"), (g_xyz, "g")],
                         convs, ("leaky",) * nl, reduce_after=nl - 1)


def cross_fwd(p, pc1, pc2, cfeat1, cfeat2, feat1, feat2, nsample):
    # TODO(synk): CrossLayer source not provided; symmetric cross aggregation + cost volume.
    _, idx12 = knn(pc1, pc2, nsample)
    _, idx21 = knn(pc2, pc1, nsample)
    # Merge the two mlp1 directions (shared weights) into one call.
    xyz_q = jnp.concatenate([pc1, pc2], 0)
    xyz_r = jnp.concatenate([pc2, pc1], 0)
    fq = jnp.concatenate([cfeat1, cfeat2], 0)
    fr = jnp.concatenate([cfeat2, cfeat1], 0)
    idx = jnp.concatenate([idx12, idx21], 0)
    f_new = _cross_agg(p["mlp1"], xyz_q, xyz_r, fq, fr, nsample, idx=idx)
    bsz = pc1.shape[0]
    f1_new, f2_new = f_new[:bsz], f_new[bsz:]
    cross = _cross_agg(p["mlp2"], pc1, pc2, f1_new, f2_new, nsample, idx=idx12)
    return f1_new, f2_new, cross


def init_sfres(pg, feat_ch, cost_ch, channels, mlp, wn=8):
    # TODO(synk): SceneFlowEstimatorResidual source not provided; PointConv stack + fc.
    last = feat_ch + cost_ch
    pcs = []
    for out in channels:
        pcs.append(init_pointconv(pg, last + 3, out, wn))
        last = out
    mlps = []
    for out in mlp:
        mlps.append(pg.conv(last, out))
        last = out
    return {"pointconvs": pcs, "mlps": mlps, "fc": pg.conv(last, 3)}


def sfres_fwd(p, xyz, feats, cost_volume, flow=None, neighbors=9):
    new_points = jnp.concatenate([feats, cost_volume.astype(feats.dtype)], -1)
    for pc in p["pointconvs"]:
        new_points = pointconv_fwd(pc, xyz, new_points, neighbors)
    if p["mlps"]:
        new_points = mlp_stack(new_points, p["mlps"], ("leaky",) * len(p["mlps"]))
    flow_local = jnp.clip(conv_pt(p["fc"], new_points, "none", out_dtype=jnp.float32),
                          -200.0, 200.0)
    flow = flow_local if flow is None else flow_local + flow
    return new_points, flow


# ---------------------------------------------------------------------------
# RecurrentUnit / full model
# ---------------------------------------------------------------------------
def init_recurrent(pg, feat_ch, feat_new_ch, latent_ch, cross_mlp1, cross_mlp2,
                   flow_channels=(64, 64)):
    return {"bid": init_bid(pg, feat_new_ch + feat_ch, cross_mlp1),
            "fe": init_fe(pg, cross_mlp1[-1], cross_mlp2),
            "flow": init_sfgru(pg, latent_ch, cross_mlp2[-1] + feat_ch,
                               list(flow_channels))}


def recurrent_fwd(p, pc1, pc2, feat1_new, feat2_new, feat1, feat2,
                  up_flow, up_feat, iters, flow_nei=32):
    c_feat1 = jnp.concatenate([feat1, feat1_new], -1)
    c_feat2 = jnp.concatenate([feat2, feat2_new], -1)
    flows = []
    feat_flow = up_feat
    for _ in range(iters):
        pc2_warp = point_warping(pc1, pc2, up_flow)
        # kNN shared between bid and fe (same query/ref pair).
        _, idx12 = knn(pc1, pc2_warp, flow_nei)
        _, idx21 = knn(pc2_warp, pc1, flow_nei)
        feat1_new, feat2_new = bid_fwd(p["bid"], pc1, pc2_warp, c_feat1, c_feat2,
                                       feat1, feat2, flow_nei, idx12=idx12, idx21=idx21)
        fe = fe_fwd(p["fe"], pc1, pc2_warp, feat1_new, feat2_new, feat1, feat2,
                    flow_nei, idx12=idx12)
        new_feat1 = jnp.concatenate([feat1, fe], -1)
        feat_flow, flow = sfgru_fwd(p["flow"], pc1, up_feat, new_feat1, up_flow)
        up_flow = flow
        up_feat = feat_flow
        c_feat1 = jnp.concatenate([feat1, feat1_new], -1)
        c_feat2 = jnp.concatenate([feat2, feat2_new], -1)
        flows.append(flow)
    return flows, feat1_new, feat2_new, feat_flow


def init_model(pg, wn=8):
    return {
        "encoder": init_encoder(pg, wn),
        "recurrent0": init_recurrent(pg, 32, 32, 64, [32, 32], [32, 32], (64, 64)),
        "recurrent1": init_recurrent(pg, 64, 64, 64, [64, 64], [64, 64], (64, 64)),
        "recurrent2": init_recurrent(pg, 128, 128, 64, [128, 128], [128, 128], (64, 64)),
        "cross3": init_cross(pg, 256 + 64, [256, 256], [256, 256]),
        "flow3": init_sfres(pg, 256, 256, [128, 64], [], wn),
        "deconv4_3": pg.conv(256, 64),
        "deconv3_2": pg.conv(256, 128),
        "deconv2_1": pg.conv(128, 64),
        "deconv1_0": pg.conv(64, 32),
    }


def model_fwd(params, xyz1, xyz2, color1, color2, *, npoints, iters,
              feat_nei=32, flow_nei=32):
    # inputs are already channels-last [B, N, 3]
    pc1s, feat1s, idx1s, pc2s, feat2s, idx2s = encoder_pair(
        params["encoder"], xyz1, xyz2, color1, color2, npoints, feat_nei)

    up1 = upsample_flow(pc1s[3], pc1s[4], feat1s[4])
    up2 = upsample_flow(pc2s[3], pc2s[4], feat2s[4])
    feat1_l4_3, feat2_l4_3 = conv_pt_pair(params["deconv4_3"], up1, up2)
    c_feat1_l3 = jnp.concatenate([feat1s[3], feat1_l4_3], -1)
    c_feat2_l3 = jnp.concatenate([feat2s[3], feat2_l4_3], -1)
    feat1_new_l3, feat2_new_l3, cross3 = cross_fwd(params["cross3"], pc1s[3], pc2s[3],
                                                   c_feat1_l3, c_feat2_l3,
                                                   feat1s[3], feat2s[3], flow_nei)
    feat3, flow3 = sfres_fwd(params["flow3"], pc1s[3], feat1s[3], cross3)

    up1 = upsample_flow(pc1s[2], pc1s[3], feat1_new_l3)
    up2 = upsample_flow(pc2s[2], pc2s[3], feat2_new_l3)
    feat1_l3_2, feat2_l3_2 = conv_pt_pair(params["deconv3_2"], up1, up2)
    up_flow2 = upsample_flow(pc1s[2], pc1s[3], SCALE * flow3)
    up_feat2 = upsample_flow(pc1s[2], pc1s[3], feat3)
    flows2, feat1_new_l2, feat2_new_l2, feat_flow_l2 = recurrent_fwd(
        params["recurrent2"], pc1s[2], pc2s[2], feat1_l3_2, feat2_l3_2,
        feat1s[2], feat2s[2], up_flow2, up_feat2, iters, flow_nei)

    up1 = upsample_flow(pc1s[1], pc1s[2], feat1_new_l2)
    up2 = upsample_flow(pc2s[1], pc2s[2], feat2_new_l2)
    feat1_l2_1, feat2_l2_1 = conv_pt_pair(params["deconv2_1"], up1, up2)
    up_flow1 = upsample_flow(pc1s[1], pc1s[2], SCALE * flows2[-1])
    up_feat1 = upsample_flow(pc1s[1], pc1s[2], feat_flow_l2)
    flows1, feat1_new_l1, feat2_new_l1, feat_flow_l1 = recurrent_fwd(
        params["recurrent1"], pc1s[1], pc2s[1], feat1_l2_1, feat2_l2_1,
        feat1s[1], feat2s[1], up_flow1, up_feat1, iters, flow_nei)

    up1 = upsample_flow(pc1s[0], pc1s[1], feat1_new_l1)
    up2 = upsample_flow(pc2s[0], pc2s[1], feat2_new_l1)
    feat1_l1_0, feat2_l1_0 = conv_pt_pair(params["deconv1_0"], up1, up2)
    up_flow0 = upsample_flow(pc1s[0], pc1s[1], SCALE * flows1[-1])
    up_feat0 = upsample_flow(pc1s[0], pc1s[1], feat_flow_l1)
    flows0, feat1_new_l0, feat2_new_l0, feat_flow_l0 = recurrent_fwd(
        params["recurrent0"], pc1s[0], pc2s[0], feat1_l1_0, feat2_l1_0,
        feat1s[0], feat2s[0], up_flow0, up_feat0, iters, flow_nei)

    flows = list(flows0[::-1]) + list(flows1[::-1]) + list(flows2[::-1]) + [flow3]
    fps_pc1_idxs = ([None] * (iters - 1) + [idx1s[0]]
                    + [None] * (iters - 1) + [idx1s[1]]
                    + [None] * (iters - 1) + [idx1s[2]])
    fps_pc2_idxs = ([None] * (iters - 1) + [idx2s[0]]
                    + [None] * (iters - 1) + [idx2s[1]]
                    + [None] * (iters - 1) + [idx2s[2]])
    return flows, fps_pc1_idxs, fps_pc2_idxs, pc1s, pc2s


# One jit over the whole forward: XLA fuses the remaining glue (gather/top-k/concat)
# around the Pallas kernels and removes per-op dispatch overhead.
model_fwd_jit = jax.jit(model_fwd,
                        static_argnames=("npoints", "iters", "feat_nei", "flow_nei"))


# ---------------------------------------------------------------------------
# Main
# ---------------------------------------------------------------------------
if __name__ == "__main__":
    key = jax.random.PRNGKey(0)
    B, N = 2, 256
    # TODO(synk): original encoder hard-codes npoints (2048, 512, 256, 64);
    # scaled down so the synthetic run stays small (kNN needs >=32 pts/level).
    NPOINTS = (128, 64, 32, 32)
    ITERS = 1   # constructor arg (default 3); 1 iteration keeps the smoke test small

    k1, k2, k3, k4, kp = jax.random.split(key, 5)
    xyz1 = jax.random.uniform(k1, (B, N, 3), jnp.float32)
    xyz2 = jax.random.uniform(k2, (B, N, 3), jnp.float32)
    color1 = jax.random.uniform(k3, (B, N, 3), jnp.float32)
    color2 = jax.random.uniform(k4, (B, N, 3), jnp.float32)

    params = init_model(ParamGen(kp), wn=8)

    flows, fps1, fps2, pc1s, pc2s = model_fwd_jit(
        params, xyz1, xyz2, color1, color2, npoints=NPOINTS, iters=ITERS)

    jax.block_until_ready(flows)
    jax.block_until_ready(pc1s)
    print("KERNEL_OK")
</pallas_src>

<mosaic_0001>
module attributes {stable_mosaic.version = 11 : i64} {
  func.func @_mlp_stack_kernel(%arg0: i32, %arg1: memref<512x3xbf16, #tpu.memory_space<vmem>>, %arg2: memref<3x32xbf16, #tpu.memory_space<vmem>>, %arg3: memref<1x32xf32, #tpu.memory_space<vmem>>, %arg4: memref<512x32xbf16, #tpu.memory_space<vmem>>) attributes {dimension_semantics = [#tpu.dimension_semantics<parallel>], iteration_bounds = array<i64: 2>, scalar_prefetch = 0 : i64, scratch_operands = 0 : i64, tpu.core_type = #tpu.core_type<tc>, window_params = [{transform_indices = @transform_0, window_bounds = array<i64: 512, 3>}, {pipeline_mode = #tpu.pipeline_mode<synchronous>, transform_indices = @transform_1, window_bounds = array<i64: 3, 32>}, {pipeline_mode = #tpu.pipeline_mode<synchronous>, transform_indices = @transform_2, window_bounds = array<i64: 1, 32>}, {transform_indices = @transform_3, window_bounds = array<i64: 512, 32>}]} {
    %c0 = arith.constant 0 : index
    %c0_0 = arith.constant 0 : index
    %0 = vector.load %arg1[%c0, %c0_0] : memref<512x3xbf16, #tpu.memory_space<vmem>>, vector<512x3xbf16>
    %c0_1 = arith.constant 0 : index
    %c0_2 = arith.constant 0 : index
    %1 = vector.load %arg2[%c0_1, %c0_2] : memref<3x32xbf16, #tpu.memory_space<vmem>>, vector<3x32xbf16>
    %c0_3 = arith.constant 0 : index
    %c0_4 = arith.constant 0 : index
    %2 = vector.load %arg3[%c0_3, %c0_4] : memref<1x32xf32, #tpu.memory_space<vmem>>, vector<1x32xf32>
    %cst = arith.constant dense<0.000000e+00> : vector<512x32xf32>
    %3 = tpu.matmul %0, %1, %cst {dimension_numbers = #tpu.dot_dimension_numbers<[1], [0], [0], [1], [0, 0, 1, 1], [], []>} : vector<512x3xbf16>, vector<3x32xbf16>, vector<512x32xf32> -> vector<512x32xf32>
    %4 = vector.broadcast %2 : vector<1x32xf32> to vector<512x32xf32>
    %5 = arith.addf %3, %4 : vector<512x32xf32>
    %cst_5 = arith.constant 0.000000e+00 : f32
    %6 = vector.broadcast %cst_5 : f32 to vector<512x32xf32>
    %7 = arith.cmpf ogt, %5, %6 : vector<512x32xf32>
    %cst_6 = arith.constant 1.000000e-01 : f32
    %8 = vector.broadcast %cst_6 : f32 to vector<512x32xf32>
    %9 = arith.mulf %8, %5 : vector<512x32xf32>
    %10 = arith.select %7, %5, %9 : vector<512x32xi1>, vector<512x32xf32>
    %11 = arith.truncf %10 : vector<512x32xf32> to vector<512x32xbf16>
    %c0_7 = arith.constant 0 : index
    %c0_8 = arith.constant 0 : index
    %12 = vector.load %arg4[%c0_7, %c0_8] : memref<512x32xbf16, #tpu.memory_space<vmem>>, vector<512x32xbf16>
    tpu.vector_store %arg4[%c0_7, %c0_8], %11 {strides = array<i32>} : memref<512x32xbf16, #tpu.memory_space<vmem>>, vector<512x32xbf16>,
    return
  }
  func.func @transform_0(%arg0: i32) -> (i32, i32) {
    %c0_i32 = arith.constant 0 : i32
    %c0_i32_0 = arith.constant 0 : i32
    return %arg0, %c0_i32 : i32, i32
  }
  func.func @transform_1(%arg0: i32) -> (i32, i32) {
    %c0_i32 = arith.constant 0 : i32
    %c0_i32_0 = arith.constant 0 : i32
    %c0_i32_1 = arith.constant 0 : i32
    return %c0_i32, %c0_i32_0 : i32, i32
  }
  func.func @transform_2(%arg0: i32) -> (i32, i32) {
    %c0_i32 = arith.constant 0 : i32
    %c0_i32_0 = arith.constant 0 : i32
    %c0_i32_1 = arith.constant 0 : i32
    return %c0_i32, %c0_i32_0 : i32, i32
  }
  func.func @transform_3(%arg0: i32) -> (i32, i32) {
    %c0_i32 = arith.constant 0 : i32
    %c0_i32_0 = arith.constant 0 : i32
    return %arg0, %c0_i32 : i32, i32
  }
}

</mosaic_0001>

<bundles_post_ra>
// kernel: tpu_custom_call.1
= control target key start
LH: loop header
LB: loop body
LE: loop exit
PB: predicated region body
PF: predicated region fallthrough
CT: control target
= control target key end

     0   :  { %s1744_s12 = smov 0   ;;  %s2101_s0 = inlined_call_operand.vmem [shape: bf16[1024,3], index: 0, kind: input, shape index: {}]   ;;  %s2102_s1 = inlined_call_operand.vmem [shape: bf16[3,32], index: 1, kind: input, shape index: {}]   ;;  %s2103_s2 = inlined_call_operand.vmem [shape: f32[1,32], index: 2, kind: input, shape index: {}]   ;;  %s2104_s3 = inlined_call_operand.vmem [shape: bf16[1024,32], index: 3, kind: output, shape index: {}]  }
   0x1 LB: > { %s1369_s13 = sadd.s32 4294967295, %s1721_s12   ;;  %p1373_p0 = scmp.ge.s32.totalorder %s1721_s12, 1  ;;  %s1721_s12 = sphi %s1744_s12, %s13_s12  }
   0x2   : > { %p138_p1 = scmp.lt.s32.totalorder %s1721_s12, 3 }
   0x4   : > { %p139_p2 = pnand %p1373_p0, %p138_p1 }
   0x5   : > { %v239_v0 = vld [vmem:[%s2102_s1] sm:$0x3] (!%p139_p2)  ;;  %vm504_vm0 = vcmask (!%p139_p2), 1040384   ;;  %vm505_vm1 = vcmask (!%p139_p2), 1041408   ;;  %s1374_s16 = sshll.u32 (!%p139_p2), %s1369_s13, 6  ;;  %v1723_v1 = vmov (!%p139_p2), 65535  }
   0x6   : > { %142 = sbr.rel (%p139_p2) target bundleno = 317 (0x13d), region = 32  ;;  %v506_v2 = vsel (!%p139_p2), %vm504_vm0, 4294967295, %v1723_v1  ;;  %p163_p3 = scmp.lt.s32.totalorder (!%p139_p2), %s1374_s16, 127  ;;  %vm407_vm2 = vcmask (!%p139_p2), 23552   ;;  %v1832_v37 = vld [vmem:[%s2103_s2] ss:$0 sm:$0xff] (!%p139_p2) }
   0x7   : > { %v507_v3 = vsel (!%p139_p2), %vm505_vm1, %v506_v2, 0  ;;  %vm1248_vm3 = vcmask (!%p139_p2), 257024  }
   0x8   : > { %v509_v4 = vand.u32 (!%p139_p2), %v507_v3, %v239_v0 }
   0xa   : > { %1606 = vmatprep.subr.bf16.mxu0 (!%p139_p2), %v509_v4  ;;  %1672 = vmatprep.subr.bf16.mxu1 (!%p139_p2), %v509_v4 }
   0xb   : > { %1607 = vmatpush3.bf16.msra.mxu0 (!%p139_p2), %v509_v4  ;;  %1673 = vmatpush3.bf16.msra.mxu1 (!%p139_p2), %v509_v4 }
   0xd   : > { %s2106_s16 = smov (!%p163_p3, %s1374_s16), 127 }
   0xe   : > { %s1375_s17 = sshll.u32 %s2106_s16, 2 }
   0xf   : > { %s1763_s20 = scalar_lea.vmem %s2101_s0, %s1375_s17  ;;  %s1844_s25 = scalar_lea.vmem %s2104_s3, %s1375_s17 }
  0x10   : > { %v1683_v5 = vld [vmem:[%s1763_s20] sm:$0xff]   ;;  %v1685_v7 = vld [vmem:[%s1763_s20 + $0x8] sm:$0xff]   ;;  %v1687_v9 = vld [vmem:[%s1763_s20 + $0x10] sm:$0xff]  }
  0x11   : > { %v1684_v6 = vld [vmem:[%s1763_s20 + $0x80] sm:$0xff]   ;;  %1608 = vmatprep.mubr.msk.bf16.mxu0 %vm407_vm2, %v1683_v5  ;;  %v1686_v8 = vld [vmem:[%s1763_s20 + $0x88] sm:$0xff]   ;;  %v1688_v10 = vld [vmem:[%s1763_s20 + $0x90] sm:$0xff]  }
  0x12   : > { %1640 = vmatprep.mubr.msk.bf16.mxu1 %vm407_vm2, %v1684_v6  ;;  %1609 = vmatmul.mubr.msk.bf16.vlgmr.msra.gmra.mrb[0].mxu0 %vm407_vm2, %v1685_v7  ;;  %v1689_v11 = vld [vmem:[%s1763_s20 + $0x18] sm:$0xff]   ;;  %v1691_v13 = vld [vmem:[%s1763_s20 + $0x20] sm:$0xff]   ;;  %v1693_v15 = vld [vmem:[%s1763_s20 + $0x28] sm:$0xff]  }
  0x13   : > { %1641 = vmatmul.mubr.msk.bf16.vlgmr.msra.gmra.mrb[0].mxu1 %vm407_vm2, %v1686_v8  ;;  %1612 = vmatprep.mubr.msk.bf16.mxu0 %vm407_vm2, %v1687_v9  ;;  %v1690_v12 = vld [vmem:[%s1763_s20 + $0x98] sm:$0xff]   ;;  %v1692_v14 = vld [vmem:[%s1763_s20 + $0xa0] sm:$0xff]   ;;  %v1694_v16 = vld [vmem:[%s1763_s20 + $0xa8] sm:$0xff]  }
  0x14   : > { %1644 = vmatprep.mubr.msk.bf16.mxu1 %vm407_vm2, %v1688_v10  ;;  %v1695_v17 = vld [vmem:[%s1763_s20 + $0x30] sm:$0xff]   ;;  %v1697_v19 = vld [vmem:[%s1763_s20 + $0x38] sm:$0xff]   ;;  %v1699_v21 = vld [vmem:[%s1763_s20 + $0x40] sm:$0xff]  }
  0x15   : > { %v1696_v18 = vld [vmem:[%s1763_s20 + $0xb0] sm:$0xff]   ;;  %v1698_v20 = vld [vmem:[%s1763_s20 + $0xb8] sm:$0xff]   ;;  %v1700_v22 = vld [vmem:[%s1763_s20 + $0xc0] sm:$0xff]  }
  0x16   : > { %v1701_v23 = vld [vmem:[%s1763_s20 + $0x48] sm:$0xff]   ;;  %v1703_v25 = vld [vmem:[%s1763_s20 + $0x50] sm:$0xff]   ;;  %v1705_v27 = vld [vmem:[%s1763_s20 + $0x58] sm:$0xff]  }
  0x17   : > { %v1702_v24 = vld [vmem:[%s1763_s20 + $0xc8] sm:$0xff]   ;;  %v1704_v26 = vld [vmem:[%s1763_s20 + $0xd0] sm:$0xff]   ;;  %v1706_v28 = vld [vmem:[%s1763_s20 + $0xd8] sm:$0xff]  }
  0x18   : > { %v1707_v29 = vld [vmem:[%s1763_s20 + $0x60] sm:$0xff]   ;;  %v1709_v31 = vld [vmem:[%s1763_s20 + $0x68] sm:$0xff]   ;;  %v1711_v33 = vld [vmem:[%s1763_s20 + $0x70] sm:$0xff]  }
  0x19   : > { %v1708_v30 = vld [vmem:[%s1763_s20 + $0xe0] sm:$0xff]   ;;  %v1710_v32 = vld [vmem:[%s1763_s20 + $0xe8] sm:$0xff]   ;;  %v1712_v34 = vld [vmem:[%s1763_s20 + $0xf0] sm:$0xff]  }
  0x1a   : > { %1613 = vmatmul.mubr.msk.bf16.gmra.mrb[4].mxu0 %vm407_vm2, %v1689_v11  ;;  %v1713_v35 = vld [vmem:[%s1763_s20 + $0x78] sm:$0xff]  }
  0x1b   : > { %1645 = vmatmul.mubr.msk.bf16.gmra.mrb[4].mxu1 %vm407_vm2, %v1690_v12  ;;  %1616 = vmatprep.mubr.msk.bf16.mxu0 %vm407_vm2, %v1691_v13  ;;  %v1714_v36 = vld [vmem:[%s1763_s20 + $0xf8] sm:$0xff]  }
  0x1c   : > { %1648 = vmatprep.mubr.msk.bf16.mxu1 %vm407_vm2, %v1692_v14 }
  0x22   : > { %1617 = vmatmul.mubr.msk.bf16.gmra.mrb[8].mxu0 %vm407_vm2, %v1693_v15 }
  0x23   : > { %1649 = vmatmul.mubr.msk.bf16.gmra.mrb[8].mxu1 %vm407_vm2, %v1694_v16  ;;  %1620 = vmatprep.mubr.msk.bf16.mxu0 %vm407_vm2, %v1695_v17 }
  0x24   : > { %1652 = vmatprep.mubr.msk.bf16.mxu1 %vm407_vm2, %v1696_v18 }
  0x2a   : > { %1621 = vmatmul.mubr.msk.bf16.gmra.mrb[12].mxu0 %vm407_vm2, %v1697_v19 }
  0x2b   : > { %1653 = vmatmul.mubr.msk.bf16.gmra.mrb[12].mxu1 %vm407_vm2, %v1698_v20  ;;  %1624 = vmatprep.mubr.msk.bf16.mxu0 %vm407_vm2, %v1699_v21 }
  0x2c   : > { %1656 = vmatprep.mubr.msk.bf16.mxu1 %vm407_vm2, %v1700_v22 }
  0x32   : > { %1625 = vmatmul.mubr.msk.bf16.gmra.mrb[16].mxu0 %vm407_vm2, %v1701_v23 }
  0x33   : > { %1657 = vmatmul.mubr.msk.bf16.gmra.mrb[16].mxu1 %vm407_vm2, %v1702_v24  ;;  %1628 = vmatprep.mubr.msk.bf16.mxu0 %vm407_vm2, %v1703_v25 }
  0x34   : > { %1660 = vmatprep.mubr.msk.bf16.mxu1 %vm407_vm2, %v1704_v26 }
  0x3a   : > { %1629 = vmatmul.mubr.msk.bf16.gmra.mrb[20].mxu0 %vm407_vm2, %v1705_v27 }
  0x3b   : > { %1661 = vmatmul.mubr.msk.bf16.gmra.mrb[20].mxu1 %vm407_vm2, %v1706_v28  ;;  %1632 = vmatprep.mubr.msk.bf16.mxu0 %vm407_vm2, %v1707_v29 }
  0x3c   : > { %1664 = vmatprep.mubr.msk.bf16.mxu1 %vm407_vm2, %v1708_v30 }
  0x42   : > { %1633 = vmatmul.mubr.msk.bf16.gmra.mrb[24].mxu0 %vm407_vm2, %v1709_v31 }
  0x43   : > { %1665 = vmatmul.mubr.msk.bf16.gmra.mrb[24].mxu1 %vm407_vm2, %v1710_v32  ;;  %1636 = vmatprep.mubr.msk.bf16.mxu0 %vm407_vm2, %v1711_v33 }
  0x44   : > { %1668 = vmatprep.mubr.msk.bf16.mxu1 %vm407_vm2, %v1712_v34 }
  0x4a   : > { %1637 = vmatmul.mubr.msk.bf16.gmra.mrb[28].mxu0 %vm407_vm2, %v1713_v35 }
  0x4b   : > { %1669 = vmatmul.mubr.msk.bf16.gmra.mrb[28].mxu1 %vm407_vm2, %v1714_v36 }
  0xe5   : > { %v1610_v38 = vpop.f32.mrb[0].mxu0 }
  0xe6   : > { %v554_v39 = vadd.f32 %v1610_v38, %v1832_v37  ;;  %v1642_v40 = vpop.f32.mrb[0].mxu1  ;;  %v545_v41 = vpop.f32.mrb[1].mxu0 }
  0xe7   : > { %v682_v42 = vadd.f32 %v1642_v40, %v1832_v37  ;;  %v546_v43 = vadd.f32 %v1832_v37, %v545_v41  ;;  %v673_v44 = vpop.f32.mrb[1].mxu1  ;;  %v1611_v45 = vpop.f32.mrb[2].mxu0 }
  0xe8   : > { %vm802_vm4 = vcmp.gt.f32.partialorder %v554_v39, 0.0  ;;  %v866_v46 = vmul.f32 0.1, %v554_v39  ;;  %v674_v47 = vadd.f32 %v1832_v37, %v673_v44  ;;  %v557_v48 = vadd.f32 %v1611_v45, %v1832_v37  ;;  %v1643_v49 = vpop.f32.mrb[2].mxu1  ;;  %v548_v50 = vpop.f32.mrb[3].mxu0 }
  0xe9   : > { %vm834_vm5 = vcmp.gt.f32.partialorder %v682_v42, 0.0  ;;  %v898_v51 = vmul.f32 0.1, %v682_v42  ;;  %vm800_vm6 = vcmp.gt.f32.partialorder %v546_v43, 0.0  ;;  %v864_v52 = vmul.f32 0.1, %v546_v43 }
  0xea   : > { %v930_v53 = vsel %vm802_vm4, %v554_v39, %v866_v46  ;;  %vm832_vm7 = vcmp.gt.f32.partialorder %v674_v47, 0.0  ;;  %v896_v54 = vmul.f32 0.1, %v674_v47  ;;  %vm803_vm8 = vcmp.gt.f32.partialorder %v557_v48, 0.0  ;;  %v676_v55 = vpop.f32.mrb[3].mxu1 }
  0xeb   : > { %v1511_v56 = vpack.c.bf16 %v930_v53, %v930_v53  ;;  %v962_v57 = vsel %vm834_vm5, %v682_v42, %v898_v51  ;;  %v928_v58 = vsel %vm800_vm6, %v546_v43, %v864_v52  ;;  %v867_v59 = vmul.f32 0.1, %v557_v48 }
  0xec   : > { %v1543_v60 = vpack.c.bf16 %v962_v57, %v962_v57  ;;  %v1509_v61 = vpack.c.bf16 %v928_v58, %v928_v58  ;;  %v960_v62 = vsel %vm832_vm7, %v674_v47, %v896_v54  ;;  %v685_v63 = vadd.f32 %v1643_v49, %v1832_v37 }
  0xed   : > { %1251 = vst.msk [vmem:[%s1844_s25 + $0x8] sm:$0xf] %vm1248_vm3, %v1511_v56  ;;  %v1541_v0 = vpack.c.bf16 %v960_v62, %v960_v62  ;;  %v931_v1 = vsel %vm803_vm8, %v557_v48, %v867_v59  ;;  %v549_v2 = vadd.f32 %v1832_v37, %v548_v50  ;;  %v677_v3 = vadd.f32 %v1832_v37, %v676_v55  ;;  %v1614_v4 = vpop.f32.mrb[4].mxu0 }
  0xee   : > { %1283 = vst.msk [vmem:[%s1844_s25 + $0x88] sm:$0xf] %vm1248_vm3, %v1543_v60  ;;  %1249 = vst.msk [vmem:[%s1844_s25] sm:$0xf] %vm1248_vm3, %v1509_v61  ;;  %v1512_v5 = vpack.c.bf16 %v931_v1, %v931_v1  ;;  %vm835_vm9 = vcmp.gt.f32.partialorder %v685_v63, 0.0  ;;  %v570_v7 = vadd.f32 %v1614_v4, %v1832_v37  ;;  %v1646_v8 = vpop.f32.mrb[4].mxu1 }
  0xef   : > { %v899_v6 = vmul.f32 0.1, %v685_v63  ;;  %v561_v9 = vpop.f32.mrb[5].mxu0  ;;  %1281 = vst.msk [vmem:[%s1844_s25 + $0x80] sm:$0xf] %vm1248_vm3, %v1541_v0  ;;  %vm801_vm10 = vcmp.gt.f32.partialorder %v549_v2, 0.0  ;;  %v698_v14 = vadd.f32 %v1646_v8, %v1832_v37 }
  0xf0   : > { %v865_v10 = vmul.f32 0.1, %v549_v2  ;;  %vm833_vm11 = vcmp.gt.f32.partialorder %v677_v3, 0.0  ;;  %v897_v11 = vmul.f32 0.1, %v677_v3  ;;  %vm806_vm12 = vcmp.gt.f32.partialorder %v570_v7, 0.0 }
  0xf1   : > { %1252 = vst.msk [vmem:[%s1844_s25 + $0xc] sm:$0xf] %vm1248_vm3, %v1512_v5  ;;  %v963_v12 = vsel %vm835_vm9, %v685_v63, %v899_v6  ;;  %v870_v13 = vmul.f32 0.1, %v570_v7  ;;  %v689_v15 = vpop.f32.mrb[5].mxu1  ;;  %v1615_v16 = vpop.f32.mrb[6].mxu0  ;;  %v562_v20 = vadd.f32 %v1832_v37, %v561_v9 }
  0xf2   : > { %v1544_v17 = vpack.c.bf16 %v963_v12, %v963_v12  ;;  %v929_v18 = vsel %vm801_vm10, %v549_v2, %v865_v10  ;;  %v961_v19 = vsel %vm833_vm11, %v677_v3, %v897_v11  ;;  %v1647_v21 = vpop.f32.mrb[6].mxu1  ;;  %v564_v22 = vpop.f32.mrb[7].mxu0  ;;  %vm838_vm13 = vcmp.gt.f32.partialorder %v698_v14, 0.0 }
  0xf3   : > { %v1510_v23 = vpack.c.bf16 %v929_v18, %v929_v18  ;;  %v1542_v24 = vpack.c.bf16 %v961_v19, %v961_v19  ;;  %v934_v25 = vsel %vm806_vm12, %v570_v7, %v870_v13  ;;  %v692_v26 = vpop.f32.mrb[7].mxu1  ;;  %v902_v28 = vmul.f32 0.1, %v698_v14 }
  0xf4   : > { %1284 = vst.msk [vmem:[%s1844_s25 + $0x8c] sm:$0xf] %vm1248_vm3, %v1544_v17  ;;  %v1515_v27 = vpack.c.bf16 %v934_v25, %v934_v25  ;;  %vm804_vm14 = vcmp.gt.f32.partialorder %v562_v20, 0.0  ;;  %v868_v29 = vmul.f32 0.1, %v562_v20  ;;  %v690_v30 = vadd.f32 %v1832_v37, %v689_v15 }
  0xf5   : > { %1250 = vst.msk [vmem:[%s1844_s25 + $0x4] sm:$0xf] %vm1248_vm3, %v1510_v23  ;;  %1282 = vst.msk [vmem:[%s1844_s25 + $0x84] sm:$0xf] %vm1248_vm3, %v1542_v24  ;;  %v573_v31 = vadd.f32 %v1615_v16, %v1832_v37  ;;  %v701_v32 = vadd.f32 %v1647_v21, %v1832_v37  ;;  %v565_v33 = vadd.f32 %v1832_v37, %v564_v22  ;;  %v1618_v38 = vpop.f32.mrb[8].mxu0 }
  0xf6   : > { %1255 = vst.msk [vmem:[%s1844_s25 + $0x18] sm:$0xf] %vm1248_vm3, %v1515_v27  ;;  %v966_v34 = vsel %vm838_vm13, %v698_v14, %v902_v28  ;;  %v932_v35 = vsel %vm804_vm14, %v562_v20, %v868_v29  ;;  %v693_v36 = vadd.f32 %v1832_v37, %v692_v26  ;;  %vm836_vm15 = vcmp.gt.f32.partialorder %v690_v30, 0.0  ;;  %v1650_v42 = vpop.f32.mrb[8].mxu1  ;;  %v577_v43 = vpop.f32.mrb[9].mxu0 }
  0xf7   : > { %v1547_v39 = vpack.c.bf16 %v966_v34, %v966_v34  ;;  %v1513_v40 = vpack.c.bf16 %v932_v35, %v932_v35  ;;  %v900_v41 = vmul.f32 0.1, %v690_v30  ;;  %vm807_vm0 = vcmp.gt.f32.partialorder %v573_v31, 0.0  ;;  %v705_v48 = vpop.f32.mrb[9].mxu1  ;;  %v1619_v49 = vpop.f32.mrb[10].mxu0 }
  0xf8   : > { %v871_v44 = vmul.f32 0.1, %v573_v31  ;;  %vm839_vm1 = vcmp.gt.f32.partialorder %v701_v32, 0.0  ;;  %v903_v45 = vmul.f32 0.1, %v701_v32  ;;  %vm805_vm2 = vcmp.gt.f32.partialorder %v565_v33, 0.0 }
  0xf9   : > { %1287 = vst.msk [vmem:[%s1844_s25 + $0x98] sm:$0xf] %vm1248_vm3, %v1547_v39  ;;  %1253 = vst.msk [vmem:[%s1844_s25 + $0x10] sm:$0xf] %vm1248_vm3, %v1513_v40  ;;  %v964_v46 = vsel %vm836_vm15, %v690_v30, %v900_v41  ;;  %v869_v47 = vmul.f32 0.1, %v565_v33  ;;  %v586_v59 = vadd.f32 %v1618_v38, %v1832_v37  ;;  %v714_v63 = vadd.f32 %v1650_v42, %v1832_v37 }
  0xfa   : > { %vm837_vm4 = vcmp.gt.f32.partialorder %v693_v36, 0.0  ;;  %v1545_v50 = vpack.c.bf16 %v964_v46, %v964_v46  ;;  %v935_v51 = vsel %vm807_vm0, %v573_v31, %v871_v44  ;;  %v967_v52 = vsel %vm839_vm1, %v701_v32, %v903_v45  ;;  %v1651_v54 = vpop.f32.mrb[10].mxu1  ;;  %v580_v55 = vpop.f32.mrb[11].mxu0 }
  0xfb   : > { %v901_v53 = vmul.f32 0.1, %v693_v36  ;;  %v1516_v56 = vpack.c.bf16 %v935_v51, %v935_v51  ;;  %v1548_v57 = vpack.c.bf16 %v967_v52, %v967_v52  ;;  %v933_v58 = vsel %vm805_vm2, %v565_v33, %v869_v47  ;;  %v708_v60 = vpop.f32.mrb[11].mxu1 }
  0xfc   : > { %1285 = vst.msk [vmem:[%s1844_s25 + $0x90] sm:$0xf] %vm1248_vm3, %v1545_v50  ;;  %v1514_v61 = vpack.c.bf16 %v933_v58, %v933_v58  ;;  %v578_v0 = vadd.f32 %v1832_v37, %v577_v43  ;;  %vm810_vm5 = vcmp.gt.f32.partialorder %v586_v59, 0.0  ;;  %v874_v2 = vmul.f32 0.1, %v586_v59 }
  0xfd   : > { %v965_v62 = vsel %vm837_vm4, %v693_v36, %v901_v53  ;;  %1256 = vst.msk [vmem:[%s1844_s25 + $0x1c] sm:$0xf] %vm1248_vm3, %v1516_v56  ;;  %1288 = vst.msk [vmem:[%s1844_s25 + $0x9c] sm:$0xf] %vm1248_vm3, %v1548_v57  ;;  %v706_v3 = vadd.f32 %v1832_v37, %v705_v48  ;;  %vm842_vm6 = vcmp.gt.f32.partialorder %v714_v63, 0.0  ;;  %v589_v8 = vadd.f32 %v1619_v49, %v1832_v37  ;;  %v1622_v9 = vpop.f32.mrb[12].mxu0 }
  0xfe   : > { %v1546_v1 = vpack.c.bf16 %v965_v62, %v965_v62  ;;  %1254 = vst.msk [vmem:[%s1844_s25 + $0x14] sm:$0xf] %vm1248_vm3, %v1514_v61  ;;  %v906_v4 = vmul.f32 0.1, %v714_v63  ;;  %vm808_vm7 = vcmp.gt.f32.partialorder %v578_v0, 0.0  ;;  %v938_v6 = vsel %vm810_vm5, %v586_v59, %v874_v2  ;;  %v1654_v10 = vpop.f32.mrb[12].mxu1 }
  0xff   : > { %v872_v5 = vmul.f32 0.1, %v578_v0  ;;  %vm840_vm8 = vcmp.gt.f32.partialorder %v706_v3, 0.0  ;;  %v904_v7 = vmul.f32 0.1, %v706_v3  ;;  %v1519_v11 = vpack.c.bf16 %v938_v6, %v938_v6  ;;  %v593_v15 = vpop.f32.mrb[13].mxu0 }
 0x100   : > { %1286 = vst.msk [vmem:[%s1844_s25 + $0x94] sm:$0xf] %vm1248_vm3, %v1546_v1  ;;  %v970_v12 = vsel %vm842_vm6, %v714_v63, %v906_v4  ;;  %v717_v14 = vadd.f32 %v1651_v54, %v1832_v37  ;;  %v721_v16 = vpop.f32.mrb[13].mxu1  ;;  %vm811_vm9 = vcmp.gt.f32.partialorder %v589_v8, 0.0  ;;  %v1623_v20 = vpop.f32.mrb[14].mxu0  ;;  %v581_v26 = vadd.f32 %v1832_v37, %v580_v55 }
 0x101   : > { %v936_v13 = vsel %vm808_vm7, %v578_v0, %v872_v5  ;;  %v1551_v17 = vpack.c.bf16 %v970_v12, %v970_v12  ;;  %v968_v19 = vsel %vm840_vm8, %v706_v3, %v904_v7  ;;  %v1655_v21 = vpop.f32.mrb[14].mxu1  ;;  %1259 = vst.msk [vmem:[%s1844_s25 + $0x28] sm:$0xf] %vm1248_vm3, %v1519_v11  ;;  %v875_v23 = vmul.f32 0.1, %v589_v8  ;;  %v596_v25 = vpop.f32.mrb[15].mxu0 }
 0x102   : > { %v1517_v18 = vpack.c.bf16 %v936_v13, %v936_v13  ;;  %v1549_v22 = vpack.c.bf16 %v968_v19, %v968_v19  ;;  %vm843_vm10 = vcmp.gt.f32.partialorder %v717_v14, 0.0  ;;  %v907_v24 = vmul.f32 0.1, %v717_v14  ;;  %v724_v30 = vpop.f32.mrb[15].mxu1 }
 0x103   : > { %1291 = vst.msk [vmem:[%s1844_s25 + $0xa8] sm:$0xf] %vm1248_vm3, %v1551_v17  ;;  %v709_v27 = vadd.f32 %v1832_v37, %v708_v60  ;;  %v602_v28 = vadd.f32 %v1622_v9, %v1832_v37  ;;  %v730_v29 = vadd.f32 %v1654_v10, %v1832_v37  ;;  %v939_v31 = vsel %vm811_vm9, %v589_v8, %v875_v23 }
 0x104   : > { %1257 = vst.msk [vmem:[%s1844_s25 + $0x20] sm:$0xf] %vm1248_vm3, %v1517_v18  ;;  %1289 = vst.msk [vmem:[%s1844_s25 + $0xa0] sm:$0xf] %vm1248_vm3, %v1549_v22  ;;  %v971_v32 = vsel %vm843_vm10, %v717_v14, %v907_v24  ;;  %v594_v33 = vadd.f32 %v1832_v37, %v593_v15  ;;  %v722_v34 = vadd.f32 %v1832_v37, %v721_v16  ;;  %vm809_vm11 = vcmp.gt.f32.partialorder %v581_v26, 0.0 }
 0x105   : > { %v1520_v35 = vpack.c.bf16 %v939_v31, %v939_v31  ;;  %v1552_v36 = vpack.c.bf16 %v971_v32, %v971_v32  ;;  %v873_v38 = vmul.f32 0.1, %v581_v26  ;;  %vm841_vm12 = vcmp.gt.f32.partialorder %v709_v27, 0.0  ;;  %v1626_v43 = vpop.f32.mrb[16].mxu0 }
 0x106   : > { %v905_v39 = vmul.f32 0.1, %v709_v27  ;;  %vm814_vm13 = vcmp.gt.f32.partialorder %v602_v28, 0.0  ;;  %v878_v40 = vmul.f32 0.1, %v602_v28  ;;  %vm846_vm14 = vcmp.gt.f32.partialorder %v730_v29, 0.0 }
 0x107   : > { %1260 = vst.msk [vmem:[%s1844_s25 + $0x2c] sm:$0xf] %vm1248_vm3, %v1520_v35  ;;  %1292 = vst.msk [vmem:[%s1844_s25 + $0xac] sm:$0xf] %vm1248_vm3, %v1552_v36  ;;  %v937_v41 = vsel %vm809_vm11, %v581_v26, %v873_v38  ;;  %v910_v42 = vmul.f32 0.1, %v730_v29  ;;  %v605_v59 = vadd.f32 %v1623_v20, %v1832_v37  ;;  %v733_v63 = vadd.f32 %v1655_v21, %v1832_v37 }
 0x108   : > { %vm812_vm15 = vcmp.gt.f32.partialorder %v594_v33, 0.0  ;;  %v1658_v44 = vpop.f32.mrb[16].mxu1  ;;  %v1518_v45 = vpack.c.bf16 %v937_v41, %v937_v41  ;;  %v969_v46 = vsel %vm841_vm12, %v709_v27, %v905_v39  ;;  %v942_v47 = vsel %vm814_vm13, %v602_v28, %v878_v40  ;;  %v609_v49 = vpop.f32.mrb[17].mxu0 }
 0x109   : > { %v876_v48 = vmul.f32 0.1, %v594_v33  ;;  %v737_v50 = vpop.f32.mrb[17].mxu1  ;;  %v1550_v51 = vpack.c.bf16 %v969_v46, %v969_v46  ;;  %v1523_v52 = vpack.c.bf16 %v942_v47, %v942_v47  ;;  %v974_v53 = vsel %vm846_vm14, %v730_v29, %v910_v42  ;;  %v1627_v54 = vpop.f32.mrb[18].mxu0 }
 0x10a   : > { %vm844_vm0 = vcmp.gt.f32.partialorder %v722_v34, 0.0  ;;  %v1659_v55 = vpop.f32.mrb[18].mxu1  ;;  %1258 = vst.msk [vmem:[%s1844_s25 + $0x24] sm:$0xf] %vm1248_vm3, %v1518_v45  ;;  %v1555_v56 = vpack.c.bf16 %v974_v53, %v974_v53  ;;  %v908_v58 = vmul.f32 0.1, %v722_v34  ;;  %v597_v0 = vadd.f32 %v1832_v37, %v596_v25 }
 0x10b   : > { %v940_v57 = vsel %vm812_vm15, %v594_v33, %v876_v48  ;;  %v612_v60 = vpop.f32.mrb[19].mxu0  ;;  %v1919_v61 = vpop.f32.mrb[19].mxu1  ;;  %1290 = vst.msk [vmem:[%s1844_s25 + $0xa4] sm:$0xf] %vm1248_vm3, %v1550_v51  ;;  %1263 = vst.msk [vmem:[%s1844_s25 + $0x38] sm:$0xf] %vm1248_vm3, %v1523_v52  ;;  %v725_v1 = vadd.f32 %v1832_v37, %v724_v30  ;;  %v618_v4 = vadd.f32 %v1626_v43, %v1832_v37 }
 0x10c   : > { %v1521_v62 = vpack.c.bf16 %v940_v57, %v940_v57  ;;  %1295 = vst.msk [vmem:[%s1844_s25 + $0xb8] sm:$0xf] %vm1248_vm3, %v1555_v56  ;;  %v972_v2 = vsel %vm844_vm0, %v722_v34, %v908_v58  ;;  %vm815_vm1 = vcmp.gt.f32.partialorder %v605_v59, 0.0  ;;  %v879_v3 = vmul.f32 0.1, %v605_v59 }
 0x10d   : > { %v1553_v5 = vpack.c.bf16 %v972_v2, %v972_v2  ;;  %vm847_vm2 = vcmp.gt.f32.partialorder %v733_v63, 0.0  ;;  %v911_v6 = vmul.f32 0.1, %v733_v63  ;;  %vm813_vm4 = vcmp.gt.f32.partialorder %v597_v0, 0.0  ;;  %v1630_v10 = vpop.f32.mrb[20].mxu0 }
 0x10e   : > { %1261 = vst.msk [vmem:[%s1844_s25 + $0x30] sm:$0xf] %vm1248_vm3, %v1521_v62  ;;  %v943_v7 = vsel %vm815_vm1, %v605_v59, %v879_v3  ;;  %v877_v8 = vmul.f32 0.1, %v597_v0  ;;  %vm845_vm5 = vcmp.gt.f32.partialorder %v725_v1, 0.0  ;;  %vm818_vm6 = vcmp.gt.f32.partialorder %v618_v4, 0.0 }
 0x10f   : > { %v909_v9 = vmul.f32 0.1, %v725_v1  ;;  %1293 = vst.msk [vmem:[%s1844_s25 + $0xb0] sm:$0xf] %vm1248_vm3, %v1553_v5  ;;  %v1524_v11 = vpack.c.bf16 %v943_v7, %v943_v7  ;;  %v975_v12 = vsel %vm847_vm2, %v733_v63, %v911_v6  ;;  %v882_v13 = vmul.f32 0.1, %v618_v4 }
 0x110   : > { %v1662_v14 = vpop.f32.mrb[20].mxu1  ;;  %v625_v15 = vpop.f32.mrb[21].mxu0  ;;  %v1556_v16 = vpack.c.bf16 %v975_v12, %v975_v12  ;;  %v941_v17 = vsel %vm813_vm4, %v597_v0, %v877_v8  ;;  %v746_v19 = vadd.f32 %v1658_v44, %v1832_v37  ;;  %v610_v25 = vadd.f32 %v1832_v37, %v609_v49 }
 0x111   : > { %v973_v18 = vsel %vm845_vm5, %v725_v1, %v909_v9  ;;  %v1937_v20 = vpop.f32.mrb[21].mxu1  ;;  %v1939_v21 = vpop.f32.mrb[22].mxu0  ;;  %1264 = vst.msk [vmem:[%s1844_s25 + $0x3c] sm:$0xf] %vm1248_vm3, %v1524_v11  ;;  %v1522_v22 = vpack.c.bf16 %v941_v17, %v941_v17  ;;  %v946_v24 = vsel %vm818_vm6, %v618_v4, %v882_v13  ;;  %v738_v30 = vadd.f32 %v1832_v37, %v737_v50 }
 0x112   : > { %v1554_v23 = vpack.c.bf16 %v973_v18, %v973_v18  ;;  %v1944_v26 = vpop.f32.mrb[22].mxu1  ;;  %v1946_v27 = vpop.f32.mrb[23].mxu0  ;;  %1296 = vst.msk [vmem:[%s1844_s25 + $0xbc] sm:$0xf] %vm1248_vm3, %v1556_v16  ;;  %v1527_v28 = vpack.c.bf16 %v946_v24, %v946_v24  ;;  %vm850_vm7 = vcmp.gt.f32.partialorder %v746_v19, 0.0  ;;  %vm816_vm8 = vcmp.gt.f32.partialorder %v610_v25, 0.0 }
 0x113   : > { %v914_v29 = vmul.f32 0.1, %v746_v19  ;;  %v1951_v31 = vpop.f32.mrb[23].mxu1  ;;  %1262 = vst.msk [vmem:[%s1844_s25 + $0x34] sm:$0xf] %vm1248_vm3, %v1522_v22  ;;  %v621_v33 = vadd.f32 %v1627_v54, %v1832_v37  ;;  %v749_v34 = vadd.f32 %v1659_v55, %v1832_v37  ;;  %vm848_vm9 = vcmp.gt.f32.partialorder %v738_v30, 0.0 }
 0x114   : > { %1294 = vst.msk [vmem:[%s1844_s25 + $0xb4] sm:$0xf] %vm1248_vm3, %v1554_v23  ;;  %v880_v32 = vmul.f32 0.1, %v610_v25  ;;  %1267 = vst.msk [vmem:[%s1844_s25 + $0x48] sm:$0xf] %vm1248_vm3, %v1527_v28  ;;  %v613_v38 = vadd.f32 %v1832_v37, %v612_v60  ;;  %v741_v53 = vadd.f32 %v1832_v37, %v1919_v61  ;;  %v634_v54 = vadd.f32 %v1630_v10, %v1832_v37 }
 0x115   : > { %v978_v35 = vsel %vm850_vm7, %v746_v19, %v914_v29  ;;  %v912_v36 = vmul.f32 0.1, %v738_v30  ;;  %vm819_vm10 = vcmp.gt.f32.partialorder %v621_v33, 0.0  ;;  %v883_v41 = vmul.f32 0.1, %v621_v33  ;;  %v1962_v45 = vpop.f32.mrb[24].mxu0 }
 0x116   : > { %v1559_v39 = vpack.c.bf16 %v978_v35, %v978_v35  ;;  %v944_v40 = vsel %vm816_vm8, %v610_v25, %v880_v32  ;;  %vm851_vm11 = vcmp.gt.f32.partialorder %v749_v34, 0.0  ;;  %v915_v44 = vmul.f32 0.1, %v749_v34  ;;  %v1666_v49 = vpop.f32.mrb[24].mxu1  ;;  %v1966_v50 = vpop.f32.mrb[25].mxu0 }
 0x117   : > { %v1525_v42 = vpack.c.bf16 %v944_v40, %v944_v40  ;;  %v976_v43 = vsel %vm848_vm9, %v738_v30, %v912_v36  ;;  %v947_v47 = vsel %vm819_vm10, %v621_v33, %v883_v41  ;;  %vm817_vm12 = vcmp.gt.f32.partialorder %v613_v38, 0.0  ;;  %v1973_v55 = vpop.f32.mrb[25].mxu1  ;;  %v1975_v56 = vpop.f32.mrb[26].mxu0 }
 0x118   : > { %1299 = vst.msk [vmem:[%s1844_s25 + $0xc8] sm:$0xf] %vm1248_vm3, %v1559_v39  ;;  %v1557_v46 = vpack.c.bf16 %v976_v43, %v976_v43  ;;  %v881_v48 = vmul.f32 0.1, %v613_v38  ;;  %v1528_v51 = vpack.c.bf16 %v947_v47, %v947_v47  ;;  %v979_v52 = vsel %vm851_vm11, %v749_v34, %v915_v44  ;;  %v1981_v62 = vpop.f32.mrb[26].mxu1  ;;  %v1983_v63 = vpop.f32.mrb[27].mxu0 }
 0x119   : > { %1265 = vst.msk [vmem:[%s1844_s25 + $0x40] sm:$0xf] %vm1248_vm3, %v1525_v42  ;;  %v1560_v57 = vpack.c.bf16 %v979_v52, %v979_v52  ;;  %v762_v59 = vadd.f32 %v1662_v14, %v1832_v37  ;;  %v626_v60 = vadd.f32 %v1832_v37, %v625_v15  ;;  %vm849_vm13 = vcmp.gt.f32.partialorder %v741_v53, 0.0  ;;  %v1987_v1 = vpop.f32.mrb[27].mxu1 }
 0x11a   : > { %1297 = vst.msk [vmem:[%s1844_s25 + $0xc0] sm:$0xf] %vm1248_vm3, %v1557_v46  ;;  %v945_v58 = vsel %vm817_vm12, %v613_v38, %v881_v48  ;;  %1268 = vst.msk [vmem:[%s1844_s25 + $0x4c] sm:$0xf] %vm1248_vm3, %v1528_v51  ;;  %v913_v0 = vmul.f32 0.1, %v741_v53  ;;  %v754_v6 = vadd.f32 %v1832_v37, %v1937_v20  ;;  %v637_v7 = vadd.f32 %v1939_v21, %v1832_v37 }
 0x11b   : > { %v1526_v61 = vpack.c.bf16 %v945_v58, %v945_v58  ;;  %vm822_vm14 = vcmp.gt.f32.partialorder %v634_v54, 0.0  ;;  %1300 = vst.msk [vmem:[%s1844_s25 + $0xcc] sm:$0xf] %vm1248_vm3, %v1560_v57  ;;  %v886_v2 = vmul.f32 0.1, %v634_v54  ;;  %vm854_vm15 = vcmp.gt.f32.partialorder %v762_v59, 0.0 }
 0x11c   : > { %v918_v3 = vmul.f32 0.1, %v762_v59  ;;  %vm820_vm0 = vcmp.gt.f32.partialorder %v626_v60, 0.0  ;;  %v977_v4 = vsel %vm849_vm13, %v741_v53, %v913_v0  ;;  %v884_v5 = vmul.f32 0.1, %v626_v60 }
 0x11d   : > { %1266 = vst.msk [vmem:[%s1844_s25 + $0x44] sm:$0xf] %vm1248_vm3, %v1526_v61  ;;  %v1558_v8 = vpack.c.bf16 %v977_v4, %v977_v4  ;;  %v950_v9 = vsel %vm822_vm14, %v634_v54, %v886_v2  ;;  %v765_v11 = vadd.f32 %v1944_v26, %v1832_v37  ;;  %vm852_vm1 = vcmp.gt.f32.partialorder %v754_v6, 0.0  ;;  %v1638_v15 = vpop.f32.mrb[28].mxu0 }
 0x11e   : > { %v982_v10 = vsel %vm854_vm15, %v762_v59, %v918_v3  ;;  %v1531_v12 = vpack.c.bf16 %v950_v9, %v950_v9  ;;  %v948_v14 = vsel %vm820_vm0, %v626_v60, %v884_v5  ;;  %v916_v17 = vmul.f32 0.1, %v754_v6  ;;  %v2001_v19 = vpop.f32.mrb[28].mxu1  ;;  %v2011_v23 = vpop.f32.mrb[29].mxu0 }
 0x11f   : > { %v1563_v13 = vpack.c.bf16 %v982_v10, %v982_v10  ;;  %1298 = vst.msk [vmem:[%s1844_s25 + $0xc4] sm:$0xf] %vm1248_vm3, %v1558_v8  ;;  %v1529_v16 = vpack.c.bf16 %v948_v14, %v948_v14  ;;  %vm823_vm2 = vcmp.gt.f32.partialorder %v637_v7, 0.0  ;;  %v887_v18 = vmul.f32 0.1, %v637_v7  ;;  %v2013_v24 = vpop.f32.mrb[29].mxu1 }
 0x120   : > { %1271 = vst.msk [vmem:[%s1844_s25 + $0x58] sm:$0xf] %vm1248_vm3, %v1531_v12  ;;  %vm855_vm4 = vcmp.gt.f32.partialorder %v765_v11, 0.0  ;;  %v919_v20 = vmul.f32 0.1, %v765_v11  ;;  %v629_v21 = vadd.f32 %v1832_v37, %v1946_v27  ;;  %v757_v22 = vadd.f32 %v1832_v37, %v1951_v31  ;;  %v2021_v27 = vpop.f32.mrb[30].mxu0 }
 0x121   : > { %1303 = vst.msk [vmem:[%s1844_s25 + $0xd8] sm:$0xf] %vm1248_vm3, %v1563_v13  ;;  %1269 = vst.msk [vmem:[%s1844_s25 + $0x50] sm:$0xf] %vm1248_vm3, %v1529_v16  ;;  %v980_v25 = vsel %vm852_vm1, %v754_v6, %v916_v17  ;;  %v951_v26 = vsel %vm823_vm2, %v637_v7, %v887_v18  ;;  %v650_v28 = vadd.f32 %v1962_v45, %v1832_v37  ;;  %v2023_v30 = vpop.f32.mrb[30].mxu1  ;;  %v2025_v34 = vpop.f32.mrb[31].mxu0 }
 0x122   : > { %v778_v29 = vadd.f32 %v1666_v49, %v1832_v37  ;;  %v1561_v31 = vpack.c.bf16 %v980_v25, %v980_v25  ;;  %v1532_v32 = vpack.c.bf16 %v951_v26, %v951_v26  ;;  %v983_v33 = vsel %vm855_vm4, %v765_v11, %v919_v20  ;;  %v2027_v35 = vpop.f32.mrb[31].mxu1 }
 0x123   : > { %vm821_vm5 = vcmp.gt.f32.partialorder %v629_v21, 0.0  ;;  %v1564_v36 = vpack.c.bf16 %v983_v33, %v983_v33  ;;  %v885_v38 = vmul.f32 0.1, %v629_v21  ;;  %vm853_vm6 = vcmp.gt.f32.partialorder %v757_v22, 0.0 }
 0x124   : > { %v917_v39 = vmul.f32 0.1, %v757_v22  ;;  %1301 = vst.msk [vmem:[%s1844_s25 + $0xd0] sm:$0xf] %vm1248_vm3, %v1561_v31  ;;  %1272 = vst.msk [vmem:[%s1844_s25 + $0x5c] sm:$0xf] %vm1248_vm3, %v1532_v32  ;;  %v642_v44 = vadd.f32 %v1832_v37, %v1966_v50  ;;  %v770_v45 = vadd.f32 %v1832_v37, %v1973_v55  ;;  %v653_v50 = vadd.f32 %v1975_v56, %v1832_v37 }
 0x125   : > { %vm826_vm7 = vcmp.gt.f32.partialorder %v650_v28, 0.0  ;;  %v890_v40 = vmul.f32 0.1, %v650_v28  ;;  %vm858_vm8 = vcmp.gt.f32.partialorder %v778_v29, 0.0  ;;  %v922_v41 = vmul.f32 0.1, %v778_v29 }
 0x126   : > { %1304 = vst.msk [vmem:[%s1844_s25 + $0xdc] sm:$0xf] %vm1248_vm3, %v1564_v36  ;;  %v949_v42 = vsel %vm821_vm5, %v629_v21, %v885_v38  ;;  %v981_v43 = vsel %vm853_vm6, %v757_v22, %v917_v39  ;;  %vm824_vm9 = vcmp.gt.f32.partialorder %v642_v44, 0.0  ;;  %v888_v53 = vmul.f32 0.1, %v642_v44 }
 0x127   : > { %v1530_v46 = vpack.c.bf16 %v949_v42, %v949_v42  ;;  %v1562_v47 = vpack.c.bf16 %v981_v43, %v981_v43  ;;  %v954_v48 = vsel %vm826_vm7, %v650_v28, %v890_v40  ;;  %v986_v49 = vsel %vm858_vm8, %v778_v29, %v922_v41 }
 0x128   : > { %v1535_v51 = vpack.c.bf16 %v954_v48, %v954_v48  ;;  %v1567_v52 = vpack.c.bf16 %v986_v49, %v986_v49  ;;  %vm856_vm10 = vcmp.gt.f32.partialorder %v770_v45, 0.0  ;;  %v920_v54 = vmul.f32 0.1, %v770_v45 }
 0x129   : > { %1270 = vst.msk [vmem:[%s1844_s25 + $0x54] sm:$0xf] %vm1248_vm3, %v1530_v46  ;;  %1302 = vst.msk [vmem:[%s1844_s25 + $0xd4] sm:$0xf] %vm1248_vm3, %v1562_v47  ;;  %v781_v55 = vadd.f32 %v1981_v62, %v1832_v37  ;;  %v952_v57 = vsel %vm824_vm9, %v642_v44, %v888_v53  ;;  %v645_v58 = vadd.f32 %v1832_v37, %v1983_v63  ;;  %vm827_vm11 = vcmp.gt.f32.partialorder %v653_v50, 0.0 }
 0x12a   : > { %1275 = vst.msk [vmem:[%s1844_s25 + $0x68] sm:$0xf] %vm1248_vm3, %v1535_v51  ;;  %1307 = vst.msk [vmem:[%s1844_s25 + $0xe8] sm:$0xf] %vm1248_vm3, %v1567_v52  ;;  %v773_v59 = vadd.f32 %v1832_v37, %v1987_v1  ;;  %v666_v60 = vadd.f32 %v1638_v15, %v1832_v37  ;;  %v1533_v61 = vpack.c.bf16 %v952_v57, %v952_v57  ;;  %v891_v0 = vmul.f32 0.1, %v653_v50 }
 0x12b   : > { %v984_v56 = vsel %vm856_vm10, %v770_v45, %v920_v54  ;;  %vm859_vm12 = vcmp.gt.f32.partialorder %v781_v55, 0.0  ;;  %v923_v62 = vmul.f32 0.1, %v781_v55  ;;  %vm825_vm13 = vcmp.gt.f32.partialorder %v645_v58, 0.0 }
 0x12c   : > { %v1565_v2 = vpack.c.bf16 %v984_v56, %v984_v56  ;;  %1273 = vst.msk [vmem:[%s1844_s25 + $0x60] sm:$0xf] %vm1248_vm3, %v1533_v61  ;;  %v955_v3 = vsel %vm827_vm11, %v653_v50, %v891_v0  ;;  %v889_v4 = vmul.f32 0.1, %v645_v58  ;;  %vm857_vm14 = vcmp.gt.f32.partialorder %v773_v59, 0.0 }
 0x12d   : > { %v921_v63 = vmul.f32 0.1, %v773_v59  ;;  %v1536_v1 = vpack.c.bf16 %v955_v3, %v955_v3  ;;  %v987_v5 = vsel %vm859_vm12, %v781_v55, %v923_v62  ;;  %vm830_vm15 = vcmp.gt.f32.partialorder %v666_v60, 0.0 }
 0x12e   : > { %1305 = vst.msk [vmem:[%s1844_s25 + $0xe0] sm:$0xf] %vm1248_vm3, %v1565_v2  ;;  %v894_v6 = vmul.f32 0.1, %v666_v60  ;;  %v1568_v7 = vpack.c.bf16 %v987_v5, %v987_v5  ;;  %v953_v8 = vsel %vm825_vm13, %v645_v58, %v889_v4  ;;  %v794_v10 = vadd.f32 %v2001_v19, %v1832_v37 }
 0x12f   : > { %v985_v9 = vsel %vm857_vm14, %v773_v59, %v921_v63  ;;  %1276 = vst.msk [vmem:[%s1844_s25 + $0x6c] sm:$0xf] %vm1248_vm3, %v1536_v1  ;;  %v1534_v11 = vpack.c.bf16 %v953_v8, %v953_v8  ;;  %v658_v14 = vadd.f32 %v1832_v37, %v2011_v23  ;;  %v786_v17 = vadd.f32 %v1832_v37, %v2013_v24 }
 0x130   : > { %v1566_v12 = vpack.c.bf16 %v985_v9, %v985_v9  ;;  %v958_v13 = vsel %vm830_vm15, %v666_v60, %v894_v6  ;;  %1308 = vst.msk [vmem:[%s1844_s25 + $0xec] sm:$0xf] %vm1248_vm3, %v1568_v7  ;;  %vm862_vm0 = vcmp.gt.f32.partialorder %v794_v10, 0.0  ;;  %v926_v16 = vmul.f32 0.1, %v794_v10 }
 0x131   : > { %v1539_v15 = vpack.c.bf16 %v958_v13, %v958_v13  ;;  %1274 = vst.msk [vmem:[%s1844_s25 + $0x64] sm:$0xf] %vm1248_vm3, %v1534_v11  ;;  %vm828_vm1 = vcmp.gt.f32.partialorder %v658_v14, 0.0  ;;  %v892_v18 = vmul.f32 0.1, %v658_v14  ;;  %v669_v19 = vadd.f32 %v2021_v27, %v1832_v37 }
 0x132   : > { %1306 = vst.msk [vmem:[%s1844_s25 + $0xe4] sm:$0xf] %vm1248_vm3, %v1566_v12  ;;  %v797_v20 = vadd.f32 %v2023_v30, %v1832_v37  ;;  %v990_v21 = vsel %vm862_vm0, %v794_v10, %v926_v16  ;;  %vm860_vm2 = vcmp.gt.f32.partialorder %v786_v17, 0.0  ;;  %v924_v22 = vmul.f32 0.1, %v786_v17 }
 0x133   : > { %1279 = vst.msk [vmem:[%s1844_s25 + $0x78] sm:$0xf] %vm1248_vm3, %v1539_v15  ;;  %v661_v23 = vadd.f32 %v1832_v37, %v2025_v34  ;;  %v1571_v24 = vpack.c.bf16 %v990_v21, %v990_v21  ;;  %v956_v25 = vsel %vm828_vm1, %v658_v14, %v892_v18  ;;  %vm831_vm4 = vcmp.gt.f32.partialorder %v669_v19, 0.0 }
 0x134   : > { %v895_v26 = vmul.f32 0.1, %v669_v19  ;;  %v1537_v28 = vpack.c.bf16 %v956_v25, %v956_v25  ;;  %v988_v29 = vsel %vm860_vm2, %v786_v17, %v924_v22  ;;  %vm863_vm5 = vcmp.gt.f32.partialorder %v797_v20, 0.0 }
 0x135   : > { %v927_v27 = vmul.f32 0.1, %v797_v20  ;;  %1311 = vst.msk [vmem:[%s1844_s25 + $0xf8] sm:$0xf] %vm1248_vm3, %v1571_v24  ;;  %v1569_v30 = vpack.c.bf16 %v988_v29, %v988_v29  ;;  %vm829_vm6 = vcmp.gt.f32.partialorder %v661_v23, 0.0  ;;  %v789_v36 = vadd.f32 %v1832_v37, %v2027_v35 }
 0x136   : > { %v959_v31 = vsel %vm831_vm4, %v669_v19, %v895_v26  ;;  %v893_v32 = vmul.f32 0.1, %v661_v23  ;;  %1277 = vst.msk [vmem:[%s1844_s25 + $0x70] sm:$0xf] %vm1248_vm3, %v1537_v28 }
 0x137   : > { %v1540_v33 = vpack.c.bf16 %v959_v31, %v959_v31  ;;  %v991_v34 = vsel %vm863_vm5, %v797_v20, %v927_v27  ;;  %1309 = vst.msk [vmem:[%s1844_s25 + $0xf0] sm:$0xf] %vm1248_vm3, %v1569_v30  ;;  %vm861_vm7 = vcmp.gt.f32.partialorder %v789_v36, 0.0  ;;  %v925_v41 = vmul.f32 0.1, %v789_v36 }
 0x138   : > { %v1572_v38 = vpack.c.bf16 %v991_v34, %v991_v34  ;;  %v957_v39 = vsel %vm829_vm6, %v661_v23, %v893_v32 }
 0x139   : > { %1280 = vst.msk [vmem:[%s1844_s25 + $0x7c] sm:$0xf] %vm1248_vm3, %v1540_v33  ;;  %v1538_v40 = vpack.c.bf16 %v957_v39, %v957_v39  ;;  %v989_v42 = vsel %vm861_vm7, %v789_v36, %v925_v41 }
 0x13a   : > { %1312 = vst.msk [vmem:[%s1844_s25 + $0xfc] sm:$0xf] %vm1248_vm3, %v1572_v38  ;;  %v1570_v43 = vpack.c.bf16 %v989_v42, %v989_v42 }
 0x13b   : > { %1278 = vst.msk [vmem:[%s1844_s25 + $0x74] sm:$0xf] %vm1248_vm3, %v1538_v40 }
 0x13c   : > { %1310 = vst.msk [vmem:[%s1844_s25 + $0xf4] sm:$0xf] %vm1248_vm3, %v1570_v43 }
 0x13d PF: > { %s13_s12 = sadd.s32 1, %s1721_s12  }
 0x13e   : > { %p10_p4 = scmp.ge.s32.totalorder %s13_s12, 4  }
 0x140   :  { %12 = sbr.rel (!%p10_p4) target bundleno = 1 (0x1), region = 62 }

</bundles_post_ra>
